<compile_context>
chip_gen: v7x
topology: tpu7x:2x2x1
jax: 0.10.0
libtpu: 0.0.40
codegen_flags: <defaults>
</compile_context>

<pallas_src>
import functools

import jax
import jax.numpy as jnp
from jax.experimental import pallas as pl
from jax.experimental.pallas import tpu as pltpu


def _round_up(x, m):
    return (x + m - 1) // m * m


def _make_conv_kernel(KH, KW, W_pad, L, apply_relu):
    def kernel(x_ref, w_ref, t_ref, o_ref):
        # x_ref: (C_in, S_ext)        flattened padded image (one batch element)
        # w_ref: (KH*KW, C_out, C_in) one (C_out, C_in) matrix per kernel tap
        #                             (BN scale already folded into the weights)
        # t_ref: (C_out, 1)           per-channel shift (conv-bias + folded BN)
        # o_ref: (C_out, L)           L = round_up(H_out * W_pad, 128); garbage
        #                             columns are cropped in the wrapper
        c_out = o_ref.shape[0]
        acc = jnp.zeros((c_out, L), jnp.float32)
        for kh in range(KH):
            for kw in range(KW):
                off = kh * W_pad + kw
                xs = x_ref[:, off:off + L].astype(jnp.float32)        # (C_in, L)
                wt = w_ref[kh * KW + kw].astype(jnp.float32)          # (C_out, C_in)
                acc = acc + jnp.dot(wt, xs,
                                    preferred_element_type=jnp.float32,
                                    precision=jax.lax.Precision.HIGHEST)
        y = acc + t_ref[...].astype(jnp.float32)
        if apply_relu:
            y = jnp.maximum(y, 0.0)
        o_ref[...] = y.astype(o_ref.dtype)

    return kernel


@functools.partial(
    jax.jit, static_argnames=("stride", "padding", "dilation", "groups", "relu"))
def basic_conv(x, weight, bias=None, bn_scale=None, bn_shift=None, *,
               stride=1, padding=0, dilation=1, groups=1, relu=True):
    """Forward of BasicConv: Conv2d(+bias) [+ BatchNorm (eval, folded)] [+ ReLU]."""
    if stride != 1 or dilation != 1 or groups != 1:
        # TODO(synk): strided / dilated / grouped convolution variants not implemented.
        raise NotImplementedError("only stride=1, dilation=1, groups=1 supported")

    B, C_in, H, W = x.shape
    C_out, C_in_w, KH, KW = weight.shape
    assert C_in_w == C_in

    H_pad, W_pad = H + 2 * padding, W + 2 * padding
    H_out, W_out = H_pad - KH + 1, W_pad - KW + 1

    # -- flattened, padded input ------------------------------------------------
    xp = x
    if padding:
        xp = jnp.pad(x, ((0, 0), (0, 0), (padding, padding), (padding, padding)))
    S_pad = H_pad * W_pad
    x_flat = xp.reshape(B, C_in, S_pad)          # row-major -> free reshape

    L = H_out * W_pad                            # valid output span (incl. KW-1 wrap cols/row)
    L_pad = _round_up(L, 128)                    # lane-dense output stores
    off_max = (KH - 1) * W_pad + (KW - 1)
    S_ext = _round_up(off_max + L_pad, 128)      # shifted slices stay in-bounds, aligned DMA
    if S_ext > S_pad:
        x_flat = jnp.pad(x_flat, ((0, 0), (0, 0), (0, S_ext - S_pad)))

    # -- fold conv-bias and eval-mode BatchNorm ---------------------------------
    # TODO(synk): training-mode BatchNorm (batch statistics) not implemented; for eval
    # pass bn_scale = gamma/sqrt(running_var+eps), bn_shift = beta - running_mean*bn_scale.
    scale = jnp.ones((C_out,), jnp.float32)
    shift = jnp.zeros((C_out,), jnp.float32)
    if bias is not None:
        shift = shift + bias.astype(jnp.float32)
    if bn_scale is not None:
        scale = scale * bn_scale.astype(jnp.float32)
        shift = shift * bn_scale.astype(jnp.float32) + bn_shift.astype(jnp.float32)

    # fold the per-channel scale into the (tiny) weights wrapper-side; the kernel
    # then only applies the shift -> saves a (C_out, L) VPU multiply per batch.
    w_scaled = weight.astype(jnp.float32) * scale.reshape(C_out, 1, 1, 1)
    # one (C_out, C_in) matrix per kernel tap
    w_taps = jnp.transpose(w_scaled, (2, 3, 0, 1)).reshape(KH * KW, C_out, C_in)
    shift2 = shift.reshape(C_out, 1)

    kernel = _make_conv_kernel(KH, KW, W_pad, L_pad, relu)

    out_flat = pl.pallas_call(
        kernel,
        out_shape=jax.ShapeDtypeStruct((B, C_out, L_pad), x.dtype),
        grid_spec=pltpu.PrefetchScalarGridSpec(
            num_scalar_prefetch=0,
            grid=(B,),
            in_specs=[
                # per-batch flattened padded image; last two dims == full dims
                pl.BlockSpec((None, C_in, S_ext), lambda b: (b, 0, 0)),
                # weights + shift: constant index map -> DMA'd into VMEM once
                pl.BlockSpec((KH * KW, C_out, C_in), lambda b: (0, 0, 0)),
                pl.BlockSpec((C_out, 1), lambda b: (0, 0)),
            ],
            out_specs=pl.BlockSpec((None, C_out, L_pad), lambda b: (b, 0, 0)),
        ),
        compiler_params=pltpu.CompilerParams(dimension_semantics=("parallel",)),
    )(x_flat, w_taps, shift2)

    # crop the lane padding and the KW-1 wrap-around columns of each output row
    out = out_flat[:, :, :L].reshape(B, C_out, H_out, W_pad)[:, :, :, :W_out]
    return out


def _reference(x, weight, bias, bn_scale, bn_shift, padding, relu):
    y = jax.lax.conv_general_dilated(
        x.astype(jnp.float32), weight.astype(jnp.float32),
        window_strides=(1, 1),
        padding=((padding, padding), (padding, padding)),
        dimension_numbers=("NCHW", "OIHW", "NCHW"),
        precision=jax.lax.Precision.HIGHEST)
    if bias is not None:
        y = y + bias.reshape(1, -1, 1, 1)
    if bn_scale is not None:
        y = y * bn_scale.reshape(1, -1, 1, 1) + bn_shift.reshape(1, -1, 1, 1)
    if relu:
        y = jnp.maximum(y, 0.0)
    return y.astype(x.dtype)


if __name__ == "__main__":
    # BasicConv(in_planes=4, out_planes=8, kernel_size=3, padding=1)
    # -> defaults: stride=1, relu=True, bn=False, bias=False
    B, C_in, C_out, H, W, K, P = 2, 4, 8, 16, 16, 3, 1
    key = jax.random.PRNGKey(0)
    kx, kw = jax.random.split(key)
    x = jax.random.normal(kx, (B, C_in, H, W), dtype=jnp.float32)
    weight = 0.1 * jax.random.normal(kw, (C_out, C_in, K, K), dtype=jnp.float32)

    out = basic_conv(x, weight, padding=P, relu=True)
    out = jax.block_until_ready(out)

    ref = _reference(x, weight, None, None, None, P, True)
    err = float(jnp.max(jnp.abs(out - ref)))
    if out.shape == ref.shape and err < 1e-4:
        print("KERNEL_OK")
    else:
        print(f"MISMATCH: shape={out.shape} vs {ref.shape}, max abs err={err}")
</pallas_src>

<mosaic_0001>
module attributes {stable_mosaic.version = 11 : i64} {
  func.func @kernel(%arg0: i32, %arg1: memref<1x4x512xf32, #tpu.memory_space<vmem>>, %arg2: memref<9x8x4xf32, #tpu.memory_space<vmem>>, %arg3: memref<8x1xf32, #tpu.memory_space<vmem>>, %arg4: memref<1x8x384xf32, #tpu.memory_space<vmem>>) attributes {dimension_semantics = [#tpu.dimension_semantics<parallel>], iteration_bounds = array<i64: 2>, scalar_prefetch = 0 : i64, scratch_operands = 0 : i64, tpu.core_type = #tpu.core_type<tc>, window_params = [{transform_indices = @transform_0, window_bounds = array<i64: 1, 4, 512>}, {pipeline_mode = #tpu.pipeline_mode<synchronous>, transform_indices = @transform_1, window_bounds = array<i64: 9, 8, 4>}, {pipeline_mode = #tpu.pipeline_mode<synchronous>, transform_indices = @transform_2, window_bounds = array<i64: 8, 1>}, {transform_indices = @transform_3, window_bounds = array<i64: 1, 8, 384>}]} {
    %cst = arith.constant 0.000000e+00 : f32
    %0 = vector.broadcast %cst : f32 to vector<8x384xf32>
    %c0 = arith.constant 0 : index
    %c0_0 = arith.constant 0 : index
    %c0_1 = arith.constant 0 : index
    %1 = vector.load %arg1[%c0, %c0_0, %c0_1] : memref<1x4x512xf32, #tpu.memory_space<vmem>>, vector<1x4x384xf32>
    %2 = vector.shape_cast %1 : vector<1x4x384xf32> to vector<4x384xf32>
    %c0_2 = arith.constant 0 : index
    %c0_3 = arith.constant 0 : index
    %c0_4 = arith.constant 0 : index
    %3 = vector.load %arg2[%c0_2, %c0_3, %c0_4] : memref<9x8x4xf32, #tpu.memory_space<vmem>>, vector<1x8x4xf32>
    %4 = vector.shape_cast %3 : vector<1x8x4xf32> to vector<8x4xf32>
    %cst_5 = arith.constant dense<0.000000e+00> : vector<8x384xf32>
    %5 = tpu.matmul %4, %2, %cst_5 {dimension_numbers = #tpu.dot_dimension_numbers<[1], [0], [0], [1], [0, 0, 1, 1], [], []>, precision = #tpu.contract_precision<fp32>} : vector<8x4xf32>, vector<4x384xf32>, vector<8x384xf32> -> vector<8x384xf32>
    %6 = arith.addf %0, %5 : vector<8x384xf32>
    %c0_6 = arith.constant 0 : index
    %c0_7 = arith.constant 0 : index
    %c1 = arith.constant 1 : index
    %7 = vector.load %arg1[%c0_6, %c0_7, %c1] : memref<1x4x512xf32, #tpu.memory_space<vmem>>, vector<1x4x384xf32>
    %8 = vector.shape_cast %7 : vector<1x4x384xf32> to vector<4x384xf32>
    %c1_8 = arith.constant 1 : index
    %c0_9 = arith.constant 0 : index
    %c0_10 = arith.constant 0 : index
    %9 = vector.load %arg2[%c1_8, %c0_9, %c0_10] : memref<9x8x4xf32, #tpu.memory_space<vmem>>, vector<1x8x4xf32>
    %10 = vector.shape_cast %9 : vector<1x8x4xf32> to vector<8x4xf32>
    %cst_11 = arith.constant dense<0.000000e+00> : vector<8x384xf32>
    %11 = tpu.matmul %10, %8, %cst_11 {dimension_numbers = #tpu.dot_dimension_numbers<[1], [0], [0], [1], [0, 0, 1, 1], [], []>, precision = #tpu.contract_precision<fp32>} : vector<8x4xf32>, vector<4x384xf32>, vector<8x384xf32> -> vector<8x384xf32>
    %12 = arith.addf %6, %11 : vector<8x384xf32>
    %c0_12 = arith.constant 0 : index
    %c0_13 = arith.constant 0 : index
    %c2 = arith.constant 2 : index
    %13 = vector.load %arg1[%c0_12, %c0_13, %c2] : memref<1x4x512xf32, #tpu.memory_space<vmem>>, vector<1x4x384xf32>
    %14 = vector.shape_cast %13 : vector<1x4x384xf32> to vector<4x384xf32>
    %c2_14 = arith.constant 2 : index
    %c0_15 = arith.constant 0 : index
    %c0_16 = arith.constant 0 : index
    %15 = vector.load %arg2[%c2_14, %c0_15, %c0_16] : memref<9x8x4xf32, #tpu.memory_space<vmem>>, vector<1x8x4xf32>
    %16 = vector.shape_cast %15 : vector<1x8x4xf32> to vector<8x4xf32>
    %cst_17 = arith.constant dense<0.000000e+00> : vector<8x384xf32>
    %17 = tpu.matmul %16, %14, %cst_17 {dimension_numbers = #tpu.dot_dimension_numbers<[1], [0], [0], [1], [0, 0, 1, 1], [], []>, precision = #tpu.contract_precision<fp32>} : vector<8x4xf32>, vector<4x384xf32>, vector<8x384xf32> -> vector<8x384xf32>
    %18 = arith.addf %12, %17 : vector<8x384xf32>
    %c0_18 = arith.constant 0 : index
    %c0_19 = arith.constant 0 : index
    %c18 = arith.constant 18 : index
    %19 = vector.load %arg1[%c0_18, %c0_19, %c18] : memref<1x4x512xf32, #tpu.memory_space<vmem>>, vector<1x4x384xf32>
    %20 = vector.shape_cast %19 : vector<1x4x384xf32> to vector<4x384xf32>
    %c3 = arith.constant 3 : index
    %c0_20 = arith.constant 0 : index
    %c0_21 = arith.constant 0 : index
    %21 = vector.load %arg2[%c3, %c0_20, %c0_21] : memref<9x8x4xf32, #tpu.memory_space<vmem>>, vector<1x8x4xf32>
    %22 = vector.shape_cast %21 : vector<1x8x4xf32> to vector<8x4xf32>
    %cst_22 = arith.constant dense<0.000000e+00> : vector<8x384xf32>
    %23 = tpu.matmul %22, %20, %cst_22 {dimension_numbers = #tpu.dot_dimension_numbers<[1], [0], [0], [1], [0, 0, 1, 1], [], []>, precision = #tpu.contract_precision<fp32>} : vector<8x4xf32>, vector<4x384xf32>, vector<8x384xf32> -> vector<8x384xf32>
    %24 = arith.addf %18, %23 : vector<8x384xf32>
    %c0_23 = arith.constant 0 : index
    %c0_24 = arith.constant 0 : index
    %c19 = arith.constant 19 : index
    %25 = vector.load %arg1[%c0_23, %c0_24, %c19] : memref<1x4x512xf32, #tpu.memory_space<vmem>>, vector<1x4x384xf32>
    %26 = vector.shape_cast %25 : vector<1x4x384xf32> to vector<4x384xf32>
    %c4 = arith.constant 4 : index
    %c0_25 = arith.constant 0 : index
    %c0_26 = arith.constant 0 : index
    %27 = vector.load %arg2[%c4, %c0_25, %c0_26] : memref<9x8x4xf32, #tpu.memory_space<vmem>>, vector<1x8x4xf32>
    %28 = vector.shape_cast %27 : vector<1x8x4xf32> to vector<8x4xf32>
    %cst_27 = arith.constant dense<0.000000e+00> : vector<8x384xf32>
    %29 = tpu.matmul %28, %26, %cst_27 {dimension_numbers = #tpu.dot_dimension_numbers<[1], [0], [0], [1], [0, 0, 1, 1], [], []>, precision = #tpu.contract_precision<fp32>} : vector<8x4xf32>, vector<4x384xf32>, vector<8x384xf32> -> vector<8x384xf32>
    %30 = arith.addf %24, %29 : vector<8x384xf32>
    %c0_28 = arith.constant 0 : index
    %c0_29 = arith.constant 0 : index
    %c20 = arith.constant 20 : index
    %31 = vector.load %arg1[%c0_28, %c0_29, %c20] : memref<1x4x512xf32, #tpu.memory_space<vmem>>, vector<1x4x384xf32>
    %32 = vector.shape_cast %31 : vector<1x4x384xf32> to vector<4x384xf32>
    %c5 = arith.constant 5 : index
    %c0_30 = arith.constant 0 : index
    %c0_31 = arith.constant 0 : index
    %33 = vector.load %arg2[%c5, %c0_30, %c0_31] : memref<9x8x4xf32, #tpu.memory_space<vmem>>, vector<1x8x4xf32>
    %34 = vector.shape_cast %33 : vector<1x8x4xf32> to vector<8x4xf32>
    %cst_32 = arith.constant dense<0.000000e+00> : vector<8x384xf32>
    %35 = tpu.matmul %34, %32, %cst_32 {dimension_numbers = #tpu.dot_dimension_numbers<[1], [0], [0], [1], [0, 0, 1, 1], [], []>, precision = #tpu.contract_precision<fp32>} : vector<8x4xf32>, vector<4x384xf32>, vector<8x384xf32> -> vector<8x384xf32>
    %36 = arith.addf %30, %35 : vector<8x384xf32>
    %c0_33 = arith.constant 0 : index
    %c0_34 = arith.constant 0 : index
    %c36 = arith.constant 36 : index
    %37 = vector.load %arg1[%c0_33, %c0_34, %c36] : memref<1x4x512xf32, #tpu.memory_space<vmem>>, vector<1x4x384xf32>
    %38 = vector.shape_cast %37 : vector<1x4x384xf32> to vector<4x384xf32>
    %c6 = arith.constant 6 : index
    %c0_35 = arith.constant 0 : index
    %c0_36 = arith.constant 0 : index
    %39 = vector.load %arg2[%c6, %c0_35, %c0_36] : memref<9x8x4xf32, #tpu.memory_space<vmem>>, vector<1x8x4xf32>
    %40 = vector.shape_cast %39 : vector<1x8x4xf32> to vector<8x4xf32>
    %cst_37 = arith.constant dense<0.000000e+00> : vector<8x384xf32>
    %41 = tpu.matmul %40, %38, %cst_37 {dimension_numbers = #tpu.dot_dimension_numbers<[1], [0], [0], [1], [0, 0, 1, 1], [], []>, precision = #tpu.contract_precision<fp32>} : vector<8x4xf32>, vector<4x384xf32>, vector<8x384xf32> -> vector<8x384xf32>
    %42 = arith.addf %36, %41 : vector<8x384xf32>
    %c0_38 = arith.constant 0 : index
    %c0_39 = arith.constant 0 : index
    %c37 = arith.constant 37 : index
    %43 = vector.load %arg1[%c0_38, %c0_39, %c37] : memref<1x4x512xf32, #tpu.memory_space<vmem>>, vector<1x4x384xf32>
    %44 = vector.shape_cast %43 : vector<1x4x384xf32> to vector<4x384xf32>
    %c7 = arith.constant 7 : index
    %c0_40 = arith.constant 0 : index
    %c0_41 = arith.constant 0 : index
    %45 = vector.load %arg2[%c7, %c0_40, %c0_41] : memref<9x8x4xf32, #tpu.memory_space<vmem>>, vector<1x8x4xf32>
    %46 = vector.shape_cast %45 : vector<1x8x4xf32> to vector<8x4xf32>
    %cst_42 = arith.constant dense<0.000000e+00> : vector<8x384xf32>
    %47 = tpu.matmul %46, %44, %cst_42 {dimension_numbers = #tpu.dot_dimension_numbers<[1], [0], [0], [1], [0, 0, 1, 1], [], []>, precision = #tpu.contract_precision<fp32>} : vector<8x4xf32>, vector<4x384xf32>, vector<8x384xf32> -> vector<8x384xf32>
    %48 = arith.addf %42, %47 : vector<8x384xf32>
    %c0_43 = arith.constant 0 : index
    %c0_44 = arith.constant 0 : index
    %c38 = arith.constant 38 : index
    %49 = vector.load %arg1[%c0_43, %c0_44, %c38] : memref<1x4x512xf32, #tpu.memory_space<vmem>>, vector<1x4x384xf32>
    %50 = vector.shape_cast %49 : vector<1x4x384xf32> to vector<4x384xf32>
    %c8 = arith.constant 8 : index
    %c0_45 = arith.constant 0 : index
    %c0_46 = arith.constant 0 : index
    %51 = vector.load %arg2[%c8, %c0_45, %c0_46] : memref<9x8x4xf32, #tpu.memory_space<vmem>>, vector<1x8x4xf32>
    %52 = vector.shape_cast %51 : vector<1x8x4xf32> to vector<8x4xf32>
    %cst_47 = arith.constant dense<0.000000e+00> : vector<8x384xf32>
    %53 = tpu.matmul %52, %50, %cst_47 {dimension_numbers = #tpu.dot_dimension_numbers<[1], [0], [0], [1], [0, 0, 1, 1], [], []>, precision = #tpu.contract_precision<fp32>} : vector<8x4xf32>, vector<4x384xf32>, vector<8x384xf32> -> vector<8x384xf32>
    %54 = arith.addf %48, %53 : vector<8x384xf32>
    %c0_48 = arith.constant 0 : index
    %c0_49 = arith.constant 0 : index
    %55 = vector.load %arg3[%c0_48, %c0_49] : memref<8x1xf32, #tpu.memory_space<vmem>>, vector<8x1xf32>
    %56 = vector.broadcast %55 : vector<8x1xf32> to vector<8x384xf32>
    %57 = arith.addf %54, %56 : vector<8x384xf32>
    %cst_50 = arith.constant 0.000000e+00 : f32
    %58 = vector.broadcast %cst_50 : f32 to vector<8x384xf32>
    %59 = arith.maximumf %57, %58 : vector<8x384xf32>
    %c0_51 = arith.constant 0 : index
    %c0_52 = arith.constant 0 : index
    %c0_53 = arith.constant 0 : index
    %60 = vector.load %arg4[%c0_51, %c0_52, %c0_53] : memref<1x8x384xf32, #tpu.memory_space<vmem>>, vector<1x8x384xf32>
    %61 = vector.shape_cast %60 : vector<1x8x384xf32> to vector<8x384xf32>
    %62 = vector.shape_cast %59 : vector<8x384xf32> to vector<1x8x384xf32>
    tpu.vector_store %arg4[%c0_51, %c0_52, %c0_53], %62 {strides = array<i32>} : memref<1x8x384xf32, #tpu.memory_space<vmem>>, vector<1x8x384xf32>,
    return
  }
  func.func @transform_0(%arg0: i32) -> (i32, i32, i32) {
    %c0_i32 = arith.constant 0 : i32
    %c0_i32_0 = arith.constant 0 : i32
    %c0_i32_1 = arith.constant 0 : i32
    return %arg0, %c0_i32, %c0_i32_0 : i32, i32, i32
  }
  func.func @transform_1(%arg0: i32) -> (i32, i32, i32) {
    %c0_i32 = arith.constant 0 : i32
    %c0_i32_0 = arith.constant 0 : i32
    %c0_i32_1 = arith.constant 0 : i32
    %c0_i32_2 = arith.constant 0 : i32
    return %c0_i32, %c0_i32_0, %c0_i32_1 : i32, i32, i32
  }
  func.func @transform_2(%arg0: i32) -> (i32, i32) {
    %c0_i32 = arith.constant 0 : i32
    %c0_i32_0 = arith.constant 0 : i32
    %c0_i32_1 = arith.constant 0 : i32
    return %c0_i32, %c0_i32_0 : i32, i32
  }
  func.func @transform_3(%arg0: i32) -> (i32, i32, i32) {
    %c0_i32 = arith.constant 0 : i32
    %c0_i32_0 = arith.constant 0 : i32
    %c0_i32_1 = arith.constant 0 : i32
    return %arg0, %c0_i32, %c0_i32_0 : i32, i32, i32
  }
}

</mosaic_0001>

<bundles_post_ra>
// kernel: basic_conv.1
= control target key start
LH: loop header
LB: loop body
LE: loop exit
PB: predicated region body
PF: predicated region fallthrough
CT: control target
= control target key end

     0   :  { %s9276_s12 = smov 0   ;;  %s10205_s0 = inlined_call_operand.vmem [shape: f32[2,4,512], index: 0, kind: input, shape index: {}]   ;;  %s10206_s1 = inlined_call_operand.vmem [shape: f32[9,8,4], index: 1, kind: input, shape index: {}]   ;;  %s10207_s2 = inlined_call_operand.vmem [shape: f32[8,1], index: 2, kind: input, shape index: {}]   ;;  %s10208_s3 = inlined_call_operand.vmem [shape: f32[2,8,384], index: 3, kind: output, shape index: {}]  }
   0x1 LB: > { %s8710_s13 = sadd.s32 4294967295, %s9243_s12   ;;  %p8714_p0 = scmp.ge.s32.totalorder %s9243_s12, 1  ;;  %s9243_s12 = sphi %s9276_s12, %s13_s12  }
   0x2   : > { %p137_p1 = scmp.lt.s32.totalorder %s9243_s12, 3 }
   0x4   : > { %p138_p2 = pnand %p8714_p0, %p137_p1 }
   0x5   : > { %p161_p3 = scmp.lt.s32.totalorder (!%p138_p2), %s8710_s13, 1  ;;  %v9245_v0 = vmov (!%p138_p2), 0.0   ;;  %s9246_s18 = smov (!%p138_p2), 127   ;;  %vm9250_vm0 = vmmov (!%p138_p2), 0   ;;  %v8718_v5 = vld [vmem:[%s10206_s1 + $0x8] sm:$0xff] (!%p138_p2)  ;;  %vm194_vm1 = vcmask (!%p138_p2), 31744  }
   0x6   : > { %141 = sbr.rel (%p138_p2) target bundleno = 786 (0x312), region = 32  ;;  %271 = vmatprep.mubr.f32.mxu0 (!%p138_p2), %v9245_v0  ;;  %8837 = vmatprep.subr.mxu1 (!%p138_p2), %v9245_v0  ;;  %s9247_s19 = smov (!%p138_p2), 126   ;;  %v196_v6 = vsel (!%p138_p2), %vm194_vm1, %v8718_v5, 0  ;;  %vm190_vm2 = vcmask (!%p138_p2), 1039360   ;;  %vm198_vm3 = vcmask (!%p138_p2), 1043456   ;;  %vm2998_vm4 = vcmask (!%p138_p2), 900096  }
   0x7   : > { %s9248_s20 = smov (!%p138_p2), 110   ;;  %s9249_s21 = smov (!%p138_p2), 109   ;;  %8839 = vmatprep.mubr.msk.f32.mxu1 (!%p138_p2), %vm9250_vm0, %v9245_v0  ;;  %v9324_v7 = vand.u32 (!%p138_p2), 4294901760, %v196_v6  ;;  %vm3941_vm5 = vcmask (!%p138_p2), 891904   ;;  %vm4884_vm6 = vcmask (!%p138_p2), 883712   ;;  %v173_v56 = vld [vmem:[%s10206_s1] sm:$0xff] (!%p138_p2) }
   0x8   : > { %s9251_s22 = smov (!%p138_p2), 108   ;;  %s9252_s23 = smov (!%p138_p2), 92   ;;  %v1120_v60 = vsel (!%p138_p2), %vm194_vm1, %v173_v56, 0  ;;  %vm5827_vm7 = vcmask (!%p138_p2), 752640   ;;  %vm2055_vm8 = vcmask (!%p138_p2), 1031168   ;;  %vm6770_vm9 = vcmask (!%p138_p2), 744448  }
   0x9   : > { %s9253_s24 = smov (!%p138_p2), 91   ;;  %s9254_s25 = smov (!%p138_p2), 90   ;;  %v9327_v8 = vsub.f32 (!%p138_p2), %v196_v6, %v9324_v7  ;;  %v9431_v5 = vand.u32 (!%p138_p2), 4294901760, %v1120_v60  ;;  %vm7713_vm10 = vcmask (!%p138_p2), 736256  }
   0xb   : > { %v9330_v10 = vand.u32 (!%p138_p2), 4294901760, %v9327_v8 }
   0xd   : > { %s10210_s13 = smov (!%p161_p3, %s8710_s13), 1  ;;  %v275_v16 = vsub.f32 %v9327_v8, %v9330_v10 }
   0xe   : > { %s8728_s14 = sshll.u32 %s10210_s13, 4 }
   0xf   : > { %s9290_s17 = scalar_lea.vmem %s10205_s0, %s8728_s14  ;;  %v276_v23 = vand.u32 4294901760, %v275_v16 }
  0x10   : > { %v9295_v1 = vld [vmem:[%s9290_s17] sm:$0xff]  ;;  %v175_v3 = vld [vmem:[%s9290_s17 + $0x8] sm:$0xff] }
  0x11   : > { %182 = vrot.lane.b32.xlu1 %v9295_v1, %s9246_s18  ;;  %v9300_v2 = vcombine.high %v9295_v1, %v9295_v1  ;;  %v181_v4 = vcombine.high %v175_v3, %v175_v3  ;;  %v172_v57 = vld [vmem:[%s9290_s17 + $0x8] sm:$0xf] }
  0x12   : > { %v1126_v61 = vsel %vm198_vm3, %v172_v57, 0 }
  0x13   : > { %184 = vrot.lane.b32.xlu0 %v9300_v2, %s9246_s18  ;;  %v1124_v52 = vsel %vm198_vm3, %v9300_v2, 0  ;;  %v9433_v6 = vand.u32 4294901760, %v1126_v61 }
  0x14   : > { %v9409_v58 = vand.u32 4294901760, %v1124_v52 }
  0x15   : > { %2049 = vrot.lane.b32.xlu1 %v9300_v2, %s9247_s19  ;;  %v9449_v16 = vsub.f32 %v1126_v61, %v9433_v6 }
  0x17   : > { %186 = vrot.lane.b32.xlu0 %v175_v3, %s9246_s18 }
  0x19   : > { %2047 = vrot.lane.b32.xlu1 %v9295_v1, %s9247_s19 }
  0x1b   : > { %2051 = vrot.lane.b32.xlu0 %v175_v3, %s9247_s19 }
  0x1d   : > { %2994 = vrot.lane.b32.xlu1 %v175_v3, %s9248_s20 }
  0x1f   : > { %2992 = vrot.lane.b32.xlu0 %v9300_v2, %s9248_s20 }
  0x21   : > { %3935 = vrot.lane.b32.xlu1 %v9300_v2, %s9249_s21 }
  0x23   : > { %2990 = vrot.lane.b32.xlu0 %v9295_v1, %s9248_s20 }
  0x25   : > { %3933 = vrot.lane.b32.xlu1 %v9295_v1, %s9249_s21 }
  0x27   : > { %3937 = vrot.lane.b32.xlu0 %v175_v3, %s9249_s21 }
  0x29   : > { %4878 = vrot.lane.b32.xlu1 %v9300_v2, %s9251_s22 }
  0x2b   : > { %188 = vrot.lane.b32.xlu0 %v181_v4, %s9246_s18 }
  0x2d   : > { %4876 = vrot.lane.b32.xlu1 %v9295_v1, %s9251_s22 }
  0x2f   : > { %4880 = vrot.lane.b32.xlu0 %v175_v3, %s9251_s22 }
  0x31   : > { %2996 = vrot.lane.b32.xlu1 %v181_v4, %s9248_s20 }
  0x33   : > { %2053 = vrot.lane.b32.xlu0 %v181_v4, %s9247_s19 }
  0x35   : > { %5823 = vrot.lane.b32.xlu1 %v175_v3, %s9252_s23 }
  0x37   : > { %5821 = vrot.lane.b32.xlu0 %v9300_v2, %s9252_s23 }
  0x39   : > { %3939 = vrot.lane.b32.xlu1 %v181_v4, %s9249_s21  ;;  %s9213_s21 = smul.u32 24, %s10210_s13 }
  0x3b   : > { %5819 = vrot.lane.b32.xlu0 %v9295_v1, %s9252_s23 }
  0x3d   : > { %6764 = vrot.lane.b32.xlu1 %v9300_v2, %s9253_s24  ;;  %v1122_v2 = vsel %vm198_vm3, %v9295_v1, 0 }
  0x3f   : > { %4882 = vrot.lane.b32.xlu0 %v181_v4, %s9251_s22 }
  0x41   : > { %6762 = vrot.lane.b32.xlu1 %v9295_v1, %s9253_s24  ;;  %v9436_v1 = vand.u32 4294901760, %v1122_v2 }
  0x43   : > { %6766 = vrot.lane.b32.xlu0 %v175_v3, %s9253_s24 }
  0x45   : > { %6768 = vrot.lane.b32.xlu1 %v181_v4, %s9253_s24  ;;  %s170_s24 = scalar_lea.vmem %s10208_s3, %s9213_s21 }
  0x47   : > { %5825 = vrot.lane.b32.xlu0 %v181_v4, %s9252_s23 }
  0x49   : > { %7709 = vrot.lane.b32.xlu1 %v175_v3, %s9254_s25 }
  0x4d   : > { %7711 = vrot.lane.b32.xlu1 %v181_v4, %s9254_s25  ;;  %v9427_v4 = vsub.f32 %v1124_v52, %v9409_v58 }
  0x83   : > { %v183_v9 = vpop.permute.xlu1 %182 }
  0x85   : > { %v185_v11 = vpop.permute.xlu0 %184 }
  0x86   : > { %v191_v12 = vsel %vm190_vm2, %v183_v9, %v185_v11 }
  0x87   : > { %v199_v13 = vsel %vm198_vm3, %v191_v12, 0  ;;  %v9334_v14 = vpop.permute.xlu1 %2049  ;;  %v1208_v12 = vand.u32 4294901760, %v9427_v4 }
  0x88   : > { %v9336_v15 = vand.u32 4294901760, %v199_v13 }
  0x89   : > { %v187_v17 = vpop.permute.xlu0 %186 }
  0x8a   : > { %v9341_v18 = vsub.f32 %v199_v13, %v9336_v15  ;;  %v192_v19 = vsel %vm190_vm2, %v185_v11, %v187_v17  ;;  %v9446_v13 = vsub.f32 %v1120_v60, %v9431_v5  ;;  %v8720_v60 = vld [vmem:[%s10206_s1 + $0x18] sm:$0xff] }
  0x8b   : > { %v201_v20 = vsel %vm198_vm3, %v192_v19, 0  ;;  %v9345_v21 = vpop.permute.xlu1 %2047 }
  0x8c   : > { %v9347_v22 = vand.u32 4294901760, %v201_v20  ;;  %v291_v24 = vand.u32 4294901760, %v9341_v18 }
  0x8d   : > { %v9350_v25 = vpop.permute.xlu0 %2051 }
  0x8e   : > { %v284_v26 = vsub.f32 %v201_v20, %v9347_v22  ;;  %206 = vmatprep.subr.mxu0 %v9347_v22  ;;  %v292_v30 = vsub.f32 %v9341_v18, %v291_v24 }
  0x8f   : > { %208 = vmatpush1.msra.mxu0 %v9336_v15  ;;  %v9355_v27 = vpop.permute.xlu1 %2994 }
  0x90   : > { %277 = vmatmul.mubr.f32.vlgmr.msra.gmra.mrb[0].mxu0 %v276_v23  ;;  %v285_v28 = vand.u32 4294901760, %v284_v26  ;;  %v293_v35 = vand.u32 4294901760, %v292_v30  ;;  %v8719_v30 = vld [vmem:[%s10206_s1 + $0x10] sm:$0xff] }
  0x91   : > { %v9357_v29 = vpop.permute.xlu0 %2992  ;;  %357 = vmatprep.mubr.f32.mxu0 %v9245_v0 }
  0x92   : > { %v286_v31 = vsub.f32 %v284_v26, %v285_v28 }
  0x93   : > { %v3936_v32 = vpop.permute.xlu1 %3935 }
  0x94   : > { %v287_v33 = vand.u32 4294901760, %v286_v31  ;;  %v2060_v31 = vsel %vm194_vm1, %v8719_v30, 0 }
  0x95   : > { %v2991_v34 = vpop.permute.xlu0 %2990 }
  0x96   : > { %v9363_v36 = vsel %vm2998_vm4, %v2991_v34, %v9357_v29  ;;  %288 = vmatprep.subr.mxu0 %v287_v33  ;;  %v9507_v34 = vand.u32 4294901760, %v2060_v31 }
  0x97   : > { %294 = vmatpush1.msra.mxu0 %v293_v35  ;;  %v3934_v37 = vpop.permute.xlu1 %3933 }
  0x98   : > { %359 = vmatmul.mubr.f32.vlgmr.msra.gmra.mrb[0].mxu0 %v9324_v7  ;;  %367 = vmatprep.subr.mxu0 %v284_v26  ;;  %v9367_v38 = vsel %vm3941_vm5, %v3934_v37, %v3936_v32 }
  0x99   : > { %370 = vmatpush1.msra.mxu0 %v9341_v18  ;;  %v9370_v39 = vpop.permute.xlu0 %3937  ;;  %433 = vmatprep.mubr.f32.mxu0 %v9245_v0  ;;  %v1672_v18 = vand.u32 4294901760, %v9449_v16 }
  0x9a   : > { %443 = vmatprep.subr.mxu0 %v9347_v22  ;;  %v9376_v40 = vsel %vm3941_vm5, %v3936_v32, %v9370_v39 }
  0x9b   : > { %v4879_v41 = vpop.permute.xlu1 %4878 }
  0x9d   : > { %v189_v42 = vpop.permute.xlu0 %188 }
  0x9e   : > { %v193_v43 = vsel %vm190_vm2, %v187_v17, %v189_v42  ;;  %v9455_v17 = vsub.f32 %v1122_v2, %v9436_v1  ;;  %v9519_v42 = vsub.f32 %v2060_v31, %v9507_v34  ;;  %v2056_v2 = vsel %vm2055_vm8, %v9345_v21, %v9334_v14 }
  0x9f   : > { %v203_v44 = vsel %vm198_vm3, %v193_v43, 0  ;;  %v4877_v45 = vpop.permute.xlu1 %4876 }
  0xa0   : > { %v9380_v46 = vand.u32 4294901760, %v203_v44  ;;  %436 = vmatmul.mubr.f32.vlgmr.msra.gmra.mrb[0].mxu0 %v9327_v8  ;;  %v9384_v47 = vsel %vm4884_vm6, %v4877_v45, %v4879_v41  ;;  %v1214_v19 = vand.u32 4294901760, %v9455_v17 }
  0xa1   : > { %445 = vmatpush1.msra.mxu0 %v9336_v15  ;;  %508 = vmatprep.mubr.f32.mxu0 %v9245_v0  ;;  %v9388_v48 = vpop.permute.xlu0 %4880 }
  0xa2   : > { %v748_v49 = vsub.f32 %v203_v44, %v9380_v46  ;;  %521 = vmatprep.subr.mxu0 %v285_v28  ;;  %8838 = vmatpush3.msra.mxu1 %v9380_v46  ;;  %v9394_v50 = vsel %vm4884_vm6, %v4879_v41, %v9388_v48 }
  0xa3   : > { %8840 = vmatmul.mubr.f32.vlgmr.msra.gmra.mrb[0].mxu1 %v276_v23  ;;  %8842 = vmatprep.subr.mxu1 %v9245_v0  ;;  %v9403_v54 = vpop.permute.xlu1 %2996  ;;  %v1215_v23 = vsub.f32 %v9455_v17, %v1214_v19 }
  0xa4   : > { %v749_v51 = vand.u32 4294901760, %v748_v49  ;;  %8844 = vmatprep.mubr.msk.f32.mxu1 %vm9250_vm0, %v9245_v0 }
  0xa5   : > { %v9401_v53 = vpop.permute.xlu0 %2053  ;;  %v1216_v28 = vand.u32 4294901760, %v1215_v23 }
  0xa6   : > { %v750_v55 = vsub.f32 %v748_v49, %v749_v51 }
  0xa7   : > { %v9415_v62 = vpop.permute.xlu1 %5823 }
  0xa8   : > { %512 = vmatmul.mubr.f32.vlgmr.msra.gmra.mrb[0].mxu0 %v9330_v10  ;;  %v751_v59 = vand.u32 4294901760, %v750_v55  ;;  %v2057_v55 = vsel %vm2055_vm8, %v9334_v14, %v9350_v25 }
  0xa9   : > { %525 = vmatpush1.msra.mxu0 %v291_v24  ;;  %588 = vmatprep.mubr.f32.mxu0 %v9245_v0  ;;  %v5822_v63 = vpop.permute.xlu0 %5821  ;;  %v2064_v57 = vsel %vm198_vm3, %v2057_v55, 0 }
  0xaa   : > { %597 = vmatprep.subr.mxu0 %v9347_v22  ;;  %8843 = vmatpush3.msra.mxu1 %v751_v59  ;;  %v9422_v3 = vsel %vm5827_vm7, %v5822_v63, %v9415_v62  ;;  %v1673_v22 = vsub.f32 %v9449_v16, %v1672_v18  ;;  %v9576_v61 = vand.u32 4294901760, %v2064_v57 }
  0xab   : > { %8845 = vmatmul.mubr.f32.vlgmr.msra.gmra.mrb[2].mxu1 %v9324_v7  ;;  %8847 = vmatprep.subr.mxu1 %v9245_v0  ;;  %v9498_v32 = vpop.permute.xlu1 %3939 }
  0xac   : > { %8848 = vmatpush3.msra.mxu1 %v748_v49  ;;  %8849 = vmatprep.mubr.msk.f32.mxu1 %vm9250_vm0, %v9245_v0  ;;  %v1674_v26 = vand.u32 4294901760, %v1673_v22 }
  0xad   : > { %8852 = vmatprep.subr.mxu1 %v9245_v0  ;;  %v5820_v9 = vpop.permute.xlu0 %5819 }
  0xae   : > { %v9439_v11 = vsel %vm5827_vm7, %v5820_v9, %v5822_v63  ;;  %v3001_v63 = vsel %vm2998_vm4, %v9355_v27, %v9403_v54  ;;  %v9592_v54 = vsub.f32 %v2064_v57, %v9576_v61  ;;  %v2062_v9 = vsel %vm198_vm3, %v2056_v2, 0 }
  0xaf   : > { %8850 = vmatmul.mubr.f32.vlgmr.msra.gmra.mrb[4].mxu1 %v9327_v8  ;;  %v1209_v8 = vsub.f32 %v9427_v4, %v1208_v12  ;;  %v6765_v41 = vpop.permute.xlu1 %6764 }
  0xb0   : > { %8853 = vmatpush3.msra.mxu1 %v9380_v46  ;;  %590 = vmatmul.mubr.f32.vlgmr.msra.gmra.mrb[0].mxu0 %v9324_v7 }
  0xb1   : > { %599 = vmatpush1.msra.mxu0 %v9336_v15  ;;  %8854 = vmatprep.mubr.msk.f32.mxu1 %vm9250_vm0, %v9245_v0  ;;  %v9467_v15 = vand.u32 4294901760, %v9446_v13  ;;  %v9514_v37 = vpop.permute.xlu0 %4882 }
  0xb2   : > { %8857 = vmatprep.subr.mxu1 %v9245_v0  ;;  %662 = vmatprep.mubr.f32.mxu0 %v9245_v0 }
  0xb3   : > { %8855 = vmatmul.mubr.f32.vlgmr.msra.gmra.mrb[6].mxu1 %v9330_v10  ;;  %1129 = vmatprep.subr.mxu0 %v9409_v58  ;;  %v1210_v10 = vand.u32 4294901760, %v1209_v8  ;;  %v1198_v20 = vsub.f32 %v9446_v13, %v9467_v15  ;;  %v6763_v45 = vpop.permute.xlu1 %6762 }
  0xb4   : > { %8858 = vmatpush3.msra.mxu1 %v749_v51  ;;  %8859 = vmatprep.mubr.msk.f32.mxu1 %vm9250_vm0, %v9245_v0  ;;  %v9535_v49 = vsel %vm6770_vm9, %v6763_v45, %v6765_v41  ;;  %v9543_v51 = vand.u32 4294901760, %v9519_v42  ;;  %v3000_v45 = vsel %vm2998_vm4, %v9357_v29, %v9355_v27 }
  0xb5   : > { %8862 = vmatprep.subr.mxu1 %v9245_v0  ;;  %v1199_v24 = vand.u32 4294901760, %v1198_v20  ;;  %v9526_v44 = vpop.permute.xlu0 %6766 }
  0xb7   : > { %8860 = vmatmul.mubr.f32.vlgmr.msra.gmra.mrb[8].mxu1 %v9324_v7 }
  0xb8   : > { %8863 = vmatpush3.msra.mxu1 %v9380_v46  ;;  %664 = vmatmul.mubr.f32.vlgmr.msra.gmra.mrb[0].mxu0 %v9324_v7  ;;  %v9532_v46 = vsel %vm6770_vm9, %v6765_v41, %v9526_v44 }
  0xb9   : > { %1131 = vmatpush1.msra.mxu0 %v9436_v1  ;;  %1194 = vmatprep.mubr.f32.mxu0 %v9245_v0 }
  0xba   : > { %8864 = vmatprep.mubr.msk.f32.mxu1 %vm9250_vm0, %v9245_v0  ;;  %8867 = vmatprep.subr.mxu1 %v9245_v0 }
  0xbb   : > { %8865 = vmatmul.mubr.f32.vlgmr.msra.gmra.mrb[10].mxu1 %v9324_v7  ;;  %1211 = vmatprep.subr.mxu0 %v1210_v10  ;;  %v2058_v7 = vsel %vm2055_vm8, %v9350_v25, %v9401_v53  ;;  %v2138_v53 = vsub.f32 %v9519_v42, %v9543_v51 }
  0xbc   : > { %8868 = vmatpush3.msra.mxu1 %v9433_v6  ;;  %8869 = vmatprep.mubr.msk.f32.mxu1 %vm9250_vm0, %v9245_v0  ;;  %v2066_v33 = vsel %vm198_vm3, %v2058_v7, 0 }
  0xbd   : > { %8872 = vmatprep.subr.mxu1 %v9245_v0  ;;  %v9512_v35 = vand.u32 4294901760, %v2066_v33  ;;  %v9567_v25 = vand.u32 4294901760, %v2138_v53  ;;  %v3007_v53 = vsel %vm198_vm3, %v3000_v45, 0  ;;  %v8724_v45 = vld [vmem:[%s10206_s1 + $0x38] sm:$0xff] }
  0xbe   : > { %v9736_v55 = vand.u32 4294901760, %v3007_v53 }
  0xbf   : > { %8870 = vmatmul.mubr.f32.vlgmr.msra.gmra.mrb[12].mxu1 %v1199_v24  ;;  %v9524_v43 = vsub.f32 %v2066_v33, %v9512_v35 }
  0xc0   : > { %1200 = vmatmul.mubr.f32.vlgmr.msra.gmra.mrb[0].mxu0 %v1199_v24  ;;  %8873 = vmatpush3.msra.mxu1 %v1674_v26  ;;  %v8721_v26 = vld [vmem:[%s10206_s1 + $0x20] sm:$0xff] }
  0xc1   : > { %1217 = vmatpush1.msra.mxu0 %v1216_v28  ;;  %1280 = vmatprep.mubr.f32.mxu0 %v9245_v0  ;;  %v2612_v52 = vand.u32 4294901760, %v9524_v43  ;;  %v3944_v28 = vsel %vm3941_vm5, %v9370_v39, %v9498_v32  ;;  %v3946_v30 = vsel %vm194_vm1, %v8721_v26, 0 }
  0xc2   : > { %8874 = vmatprep.mubr.msk.f32.mxu1 %vm9250_vm0, %v9245_v0  ;;  %8877 = vmatprep.subr.mxu1 %v9245_v0  ;;  %v3952_v7 = vsel %vm198_vm3, %v3944_v28, 0  ;;  %v9678_v39 = vand.u32 4294901760, %v3946_v30 }
  0xc3   : > { %8875 = vmatmul.mubr.f32.vlgmr.msra.gmra.mrb[14].mxu1 %v9431_v5  ;;  %1290 = vmatprep.subr.mxu0 %v9427_v4  ;;  %v2613_v56 = vsub.f32 %v9524_v43, %v2612_v52  ;;  %v3003_v4 = vsel %vm194_vm1, %v8720_v60, 0  ;;  %v9683_v31 = vand.u32 4294901760, %v3952_v7  ;;  %v9751_v60 = vsub.f32 %v3007_v53, %v9736_v55 }
  0xc4   : > { %8878 = vmatpush3.msra.mxu1 %v9449_v16  ;;  %8879 = vmatprep.mubr.msk.f32.mxu1 %vm9250_vm0, %v9245_v0  ;;  %v9600_v14 = vand.u32 4294901760, %v3003_v4  ;;  %v9688_v32 = vsub.f32 %v3946_v30, %v9678_v39  ;;  %v6775_v53 = vsel %vm194_vm1, %v8724_v45, 0 }
  0xc5   : > { %8882 = vmatprep.subr.mxu1 %v9245_v0  ;;  %v2614_v59 = vand.u32 4294901760, %v2613_v56  ;;  %v9693_v33 = vsub.f32 %v3952_v7, %v9683_v31  ;;  %v4887_v56 = vsel %vm4884_vm6, %v9388_v48, %v9514_v37  ;;  %v7697_v48 = vld [vmem:[%s9290_s17] sm:$0xff] }
  0xc6   : > { %v9613_v16 = vsub.f32 %v3003_v4, %v9600_v14 }
  0xc7   : > { %8880 = vmatmul.mubr.f32.vlgmr.msra.gmra.mrb[16].mxu1 %v9446_v13  ;;  %v4498_v41 = vand.u32 4294901760, %v9693_v33 }
  0xc8   : > { %1282 = vmatmul.mubr.f32.vlgmr.msra.gmra.mrb[0].mxu0 %v9431_v5  ;;  %8883 = vmatpush3.msra.mxu1 %v9433_v6 }
  0xc9   : > { %1293 = vmatpush1.msra.mxu0 %v9455_v17  ;;  %1356 = vmatprep.mubr.f32.mxu0 %v9245_v0 }
  0xca   : > { %8884 = vmatprep.mubr.msk.f32.mxu1 %vm9250_vm0, %v9245_v0  ;;  %8887 = vmatprep.subr.mxu1 %v9245_v0 }
  0xcb   : > { %8885 = vmatmul.mubr.f32.vlgmr.msra.gmra.mrb[18].mxu1 %v9467_v15  ;;  %1366 = vmatprep.subr.mxu0 %v9409_v58 }
  0xcc   : > { %8888 = vmatpush3.msra.mxu1 %v1672_v18  ;;  %8889 = vmatprep.mubr.msk.f32.mxu1 %vm9250_vm0, %v9245_v0 }
  0xcd   : > { %8892 = vmatprep.subr.mxu1 %v9245_v0 }
  0xcf   : > { %8890 = vmatmul.mubr.f32.vlgmr.msra.gmra.mrb[20].mxu1 %v9431_v5 }
  0xd0   : > { %1359 = vmatmul.mubr.f32.vlgmr.msra.gmra.mrb[0].mxu0 %v9446_v13  ;;  %8893 = vmatpush3.msra.mxu1 %v9433_v6  ;;  %v3009_v6 = vsel %vm198_vm3, %v3001_v63, 0  ;;  %v2148_v13 = vand.u32 4294901760, %v9592_v54 }
  0xd1   : > { %1368 = vmatpush1.msra.mxu0 %v9436_v1  ;;  %1431 = vmatprep.mubr.f32.mxu0 %v9245_v0  ;;  %v9605_v21 = vand.u32 4294901760, %v3009_v6 }
  0xd2   : > { %8894 = vmatprep.mubr.msk.f32.mxu1 %vm9250_vm0, %v9245_v0  ;;  %8897 = vmatprep.subr.mxu1 %v9245_v0  ;;  %v2149_v8 = vsub.f32 %v9592_v54, %v2148_v13 }
  0xd3   : > { %8895 = vmatmul.mubr.f32.vlgmr.msra.gmra.mrb[22].mxu1 %v9431_v5  ;;  %1444 = vmatprep.subr.mxu0 %v1208_v12  ;;  %v9607_v12 = vand.u32 4294901760, %v2062_v9 }
  0xd4   : > { %8898 = vmatpush3.msra.mxu1 %v9512_v35  ;;  %8899 = vmatprep.mubr.msk.f32.mxu1 %vm9250_vm0, %v9245_v0 }
  0xd5   : > { %8902 = vmatprep.subr.mxu1 %v9245_v0  ;;  %v9621_v17 = vsub.f32 %v2062_v9, %v9607_v12 }
  0xd7   : > { %8900 = vmatmul.mubr.f32.vlgmr.msra.gmra.mrb[24].mxu1 %v9567_v25  ;;  %v2154_v18 = vand.u32 4294901760, %v9621_v17 }
  0xd8   : > { %1435 = vmatmul.mubr.f32.vlgmr.msra.gmra.mrb[0].mxu0 %v9467_v15  ;;  %8903 = vmatpush3.msra.mxu1 %v2614_v59  ;;  %v9634_v15 = vand.u32 4294901760, %v9613_v16  ;;  %v3005_v59 = vsel %vm198_vm3, %v9363_v36, 0 }
  0xd9   : > { %1448 = vmatpush1.msra.mxu0 %v1214_v19  ;;  %1511 = vmatprep.mubr.f32.mxu0 %v9245_v0  ;;  %v2150_v19 = vand.u32 4294901760, %v2149_v8  ;;  %v2155_v22 = vsub.f32 %v9621_v17, %v2154_v18  ;;  %v9766_v63 = vand.u32 4294901760, %v3005_v59 }
  0xda   : > { %8904 = vmatprep.mubr.msk.f32.mxu1 %vm9250_vm0, %v9245_v0  ;;  %8907 = vmatprep.subr.mxu1 %v9245_v0  ;;  %v3081_v10 = vsub.f32 %v9613_v16, %v9634_v15 }
  0xdb   : > { %8905 = vmatmul.mubr.f32.vlgmr.msra.gmra.mrb[26].mxu1 %v9507_v34  ;;  %1520 = vmatprep.subr.mxu0 %v9409_v58  ;;  %v9618_v58 = vsub.f32 %v3009_v6, %v9605_v21  ;;  %v2156_v24 = vand.u32 4294901760, %v2155_v22  ;;  %v9781_v6 = vsub.f32 %v3005_v59, %v9766_v63 }
  0xdc   : > { %8908 = vmatpush3.msra.mxu1 %v9524_v43  ;;  %8909 = vmatprep.mubr.msk.f32.mxu1 %vm9250_vm0, %v9245_v0 }
  0xdd   : > { %8912 = vmatprep.subr.mxu1 %v9245_v0 }
  0xdf   : > { %8910 = vmatmul.mubr.f32.vlgmr.msra.gmra.mrb[28].mxu1 %v9519_v42 }
  0xe0   : > { %1513 = vmatmul.mubr.f32.vlgmr.msra.gmra.mrb[0].mxu0 %v9431_v5  ;;  %8913 = vmatpush3.msra.mxu1 %v9512_v35 }
  0xe1   : > { %1522 = vmatpush1.msra.mxu0 %v9436_v1  ;;  %1585 = vmatprep.mubr.f32.mxu0 %v9245_v0  ;;  %v3555_v1 = vand.u32 4294901760, %v9618_v58 }
  0xe2   : > { %8914 = vmatprep.mubr.msk.f32.mxu1 %vm9250_vm0, %v9245_v0  ;;  %2069 = vmatprep.subr.mxu0 %v9576_v61 }
  0xe3   : > { %8915 = vmatmul.mubr.f32.vlgmr.msra.gmra.mrb[30].mxu1 %v9543_v51  ;;  %8917 = vmatprep.subr.mxu1 %v9245_v0  ;;  %v3556_v20 = vsub.f32 %v9618_v58, %v3555_v1 }
  0xe4   : > { %8918 = vmatpush3.msra.mxu1 %v2612_v52  ;;  %8919 = vmatprep.mubr.msk.f32.mxu1 %vm9250_vm0, %v9245_v0  ;;  %v4499_v52 = vsub.f32 %v9693_v33, %v4498_v41 }
  0xe5   : > { %8922 = vmatprep.subr.mxu1 %v9245_v0  ;;  %v3557_v23 = vand.u32 4294901760, %v3556_v20 }
  0xe6   : > { %v4500_v29 = vand.u32 4294901760, %v4499_v52 }
  0xe7   : > { %8920 = vmatmul.mubr.f32.vlgmr.msra.gmra.mrb[32].mxu1 %v9507_v34 }
  0xe8   : > { %1587 = vmatmul.mubr.f32.vlgmr.msra.gmra.mrb[0].mxu0 %v9431_v5  ;;  %8923 = vmatpush3.msra.mxu1 %v9512_v35  ;;  %v9656_v5 = vand.u32 4294901760, %v3081_v10  ;;  %v9703_v35 = vand.u32 4294901760, %v9688_v32  ;;  %v8723_v10 = vld [vmem:[%s10206_s1 + $0x30] sm:$0xff] }
  0xe9   : > { %2071 = vmatpush1.msra.mxu0 %v9607_v12  ;;  %2134 = vmatprep.mubr.f32.mxu0 %v9245_v0  ;;  %v5832_v22 = vsel %vm194_vm1, %v8723_v10, 0 }
  0xea   : > { %2151 = vmatprep.subr.mxu0 %v2150_v19  ;;  %8924 = vmatprep.mubr.msk.f32.mxu1 %vm9250_vm0, %v9245_v0  ;;  %v4024_v43 = vsub.f32 %v9688_v32, %v9703_v35 }
  0xeb   : > { %8925 = vmatmul.mubr.f32.vlgmr.msra.gmra.mrb[34].mxu1 %v9507_v34  ;;  %8927 = vmatprep.subr.mxu1 %v9245_v0 }
  0xec   : > { %8928 = vmatpush3.msra.mxu1 %v9605_v21  ;;  %8929 = vmatprep.mubr.msk.f32.mxu1 %vm9250_vm0, %v9245_v0  ;;  %v9727_v27 = vand.u32 4294901760, %v4024_v43 }
  0xed   : > { %8932 = vmatprep.subr.mxu1 %v9245_v0 }
  0xef   : > { %8930 = vmatmul.mubr.f32.vlgmr.msra.gmra.mrb[36].mxu1 %v9656_v5 }
  0xf0   : > { %2140 = vmatmul.mubr.f32.vlgmr.msra.gmra.mrb[0].mxu0 %v9567_v25  ;;  %8933 = vmatpush3.msra.mxu1 %v3557_v23  ;;  %v4895_v25 = vsel %vm198_vm3, %v4887_v56, 0 }
  0xf1   : > { %2157 = vmatpush1.msra.mxu0 %v2156_v24  ;;  %2220 = vmatprep.mubr.f32.mxu0 %v9245_v0  ;;  %v9764_v36 = vand.u32 4294901760, %v4895_v25 }
  0xf2   : > { %2230 = vmatprep.subr.mxu0 %v9592_v54  ;;  %8934 = vmatprep.mubr.msk.f32.mxu1 %vm9250_vm0, %v9245_v0 }
  0xf3   : > { %8935 = vmatmul.mubr.f32.vlgmr.msra.gmra.mrb[38].mxu1 %v9600_v14  ;;  %8937 = vmatprep.subr.mxu1 %v9245_v0  ;;  %v9778_v4 = vsub.f32 %v4895_v25, %v9764_v36 }
  0xf4   : > { %8938 = vmatpush3.msra.mxu1 %v9618_v58  ;;  %8939 = vmatprep.mubr.msk.f32.mxu1 %vm9250_vm0, %v9245_v0 }
  0xf5   : > { %8942 = vmatprep.subr.mxu1 %v9245_v0 }
  0xf7   : > { %8940 = vmatmul.mubr.f32.vlgmr.msra.gmra.mrb[40].mxu1 %v9613_v16 }
  0xf8   : > { %2222 = vmatmul.mubr.f32.vlgmr.msra.gmra.mrb[0].mxu0 %v9507_v34  ;;  %8943 = vmatpush3.msra.mxu1 %v9605_v21 }
  0xf9   : > { %2233 = vmatpush1.msra.mxu0 %v9621_v17  ;;  %2296 = vmatprep.mubr.f32.mxu0 %v9245_v0 }
  0xfa   : > { %2306 = vmatprep.subr.mxu0 %v9576_v61  ;;  %8944 = vmatprep.mubr.msk.f32.mxu1 %vm9250_vm0, %v9245_v0 }
  0xfb   : > { %8945 = vmatmul.mubr.f32.vlgmr.msra.gmra.mrb[42].mxu1 %v9634_v15  ;;  %8947 = vmatprep.subr.mxu1 %v9245_v0 }
  0xfc   : > { %8948 = vmatpush3.msra.mxu1 %v3555_v1  ;;  %8949 = vmatprep.mubr.msk.f32.mxu1 %vm9250_vm0, %v9245_v0  ;;  %v5826_v1 = vpop.permute.xlu0 %5825 }
  0xfd   : > { %8952 = vmatprep.subr.mxu1 %v9245_v0  ;;  %v5830_v20 = vsel %vm5827_vm7, %v9415_v62, %v5826_v1  ;;  %v9838_v62 = vand.u32 4294901760, %v5832_v22 }
  0xfe   : > { %v5838_v23 = vsel %vm198_vm3, %v5830_v20, 0 }
  0xff   : > { %8950 = vmatmul.mubr.f32.vlgmr.msra.gmra.mrb[44].mxu1 %v9600_v14  ;;  %v9848_v24 = vsub.f32 %v5832_v22, %v9838_v62  ;;  %v8640_v22 = vld [vmem:[%s10207_s2] sm:$0xff] }
 0x100   : > { %2299 = vmatmul.mubr.f32.vlgmr.msra.gmra.mrb[0].mxu0 %v9519_v42  ;;  %8953 = vmatpush3.msra.mxu1 %v9605_v21  ;;  %v8722_v42 = vld [vmem:[%s10206_s1 + $0x28] sm:$0xff]  ;;  %v5441_v21 = vand.u32 4294901760, %v9778_v4 }
 0x101   : > { %2308 = vmatpush1.msra.mxu0 %v9607_v12  ;;  %2371 = vmatprep.mubr.f32.mxu0 %v9245_v0  ;;  %v4889_v57 = vsel %vm194_vm1, %v8722_v42, 0  ;;  %v9863_v28 = vand.u32 4294901760, %v9848_v24 }
 0x102   : > { %2384 = vmatprep.subr.mxu0 %v2148_v13  ;;  %8954 = vmatprep.mubr.msk.f32.mxu1 %vm9250_vm0, %v9245_v0  ;;  %v9759_v37 = vand.u32 4294901760, %v4889_v57  ;;  %v5442_v17 = vsub.f32 %v9778_v4, %v5441_v21 }
 0x103   : > { %8955 = vmatmul.mubr.f32.vlgmr.msra.gmra.mrb[46].mxu1 %v9600_v14  ;;  %8957 = vmatprep.subr.mxu1 %v9245_v0  ;;  %v5910_v7 = vsub.f32 %v9848_v24, %v9863_v28 }
 0x104   : > { %8958 = vmatpush3.msra.mxu1 %v9683_v31  ;;  %8959 = vmatprep.mubr.msk.f32.mxu1 %vm9250_vm0, %v9245_v0  ;;  %v9773_v2 = vsub.f32 %v4889_v57, %v9759_v37 }
 0x105   : > { %8962 = vmatprep.subr.mxu1 %v9245_v0 }
 0x106   : > { %v9794_v9 = vand.u32 4294901760, %v9773_v2 }
 0x107   : > { %8960 = vmatmul.mubr.f32.vlgmr.msra.gmra.mrb[48].mxu1 %v9727_v27 }
 0x108   : > { %2375 = vmatmul.mubr.f32.vlgmr.msra.gmra.mrb[0].mxu0 %v9543_v51  ;;  %8963 = vmatpush3.msra.mxu1 %v4500_v29  ;;  %v7703_v51 = vcombine.high %v7697_v48, %v7697_v48  ;;  %v4967_v58 = vsub.f32 %v9773_v2, %v9794_v9 }
 0x109   : > { %2388 = vmatpush1.msra.mxu0 %v2154_v18  ;;  %2451 = vmatprep.mubr.f32.mxu0 %v9245_v0  ;;  %v5443_v18 = vand.u32 4294901760, %v5442_v17 }
 0x10a   : > { %2460 = vmatprep.subr.mxu0 %v9576_v61  ;;  %8964 = vmatprep.mubr.msk.f32.mxu1 %vm9250_vm0, %v9245_v0  ;;  %v3091_v61 = vand.u32 4294901760, %v9751_v60 }
 0x10b   : > { %8965 = vmatmul.mubr.f32.vlgmr.msra.gmra.mrb[50].mxu1 %v9678_v39  ;;  %8967 = vmatprep.subr.mxu1 %v9245_v0 }
 0x10c   : > { %8968 = vmatpush3.msra.mxu1 %v9693_v33  ;;  %8969 = vmatprep.mubr.msk.f32.mxu1 %vm9250_vm0, %v9245_v0  ;;  %v3092_v54 = vsub.f32 %v9751_v60, %v3091_v61  ;;  %v3950_v33 = vsel %vm198_vm3, %v9376_v40, 0 }
 0x10d   : > { %8972 = vmatprep.subr.mxu1 %v9245_v0  ;;  %7707 = vrot.lane.b32.xlu0 %v7703_v51, %s9254_s25  ;;  %v9894_v40 = vand.u32 4294901760, %v3950_v33 }
 0x10e   : > { %v3093_v13 = vand.u32 4294901760, %v3092_v54 }
 0x10f   : > { %8970 = vmatmul.mubr.f32.vlgmr.msra.gmra.mrb[52].mxu1 %v9688_v32  ;;  %v9906_v42 = vsub.f32 %v3950_v33, %v9894_v40 }
 0x110   : > { %2453 = vmatmul.mubr.f32.vlgmr.msra.gmra.mrb[0].mxu0 %v9507_v34  ;;  %8973 = vmatpush3.msra.mxu1 %v9683_v31 }
 0x111   : > { %2462 = vmatpush1.msra.mxu0 %v9607_v12  ;;  %2525 = vmatprep.mubr.f32.mxu0 %v9245_v0  ;;  %v3097_v12 = vand.u32 4294901760, %v9781_v6 }
 0x112   : > { %3012 = vmatprep.subr.mxu0 %v9736_v55  ;;  %8974 = vmatprep.mubr.msk.f32.mxu1 %vm9250_vm0, %v9245_v0 }
 0x113   : > { %8975 = vmatmul.mubr.f32.vlgmr.msra.gmra.mrb[54].mxu1 %v9703_v35  ;;  %8977 = vmatprep.subr.mxu1 %v9245_v0  ;;  %v3098_v8 = vsub.f32 %v9781_v6, %v3097_v12 }
 0x114   : > { %8978 = vmatpush3.msra.mxu1 %v4498_v41  ;;  %8979 = vmatprep.mubr.msk.f32.mxu1 %vm9250_vm0, %v9245_v0  ;;  %v6769_v41 = vpop.permute.xlu1 %6768 }
 0x115   : > { %8982 = vmatprep.subr.mxu1 %v9245_v0  ;;  %7705 = vrot.lane.b32.xlu0 %v7697_v48, %s9254_s25  ;;  %v3099_v19 = vand.u32 4294901760, %v3098_v8  ;;  %v6773_v52 = vsel %vm6770_vm9, %v9526_v44, %v6769_v41  ;;  %v3948_v44 = vsel %vm198_vm3, %v9367_v38, 0  ;;  %v4034_v38 = vand.u32 4294901760, %v9906_v42 }
 0x116   : > { %v6781_v29 = vsel %vm198_vm3, %v6773_v52, 0  ;;  %v9922_v57 = vand.u32 4294901760, %v3948_v44  ;;  %v4891_v41 = vsel %vm198_vm3, %v9384_v47, 0 }
 0x117   : > { %8980 = vmatmul.mubr.f32.vlgmr.msra.gmra.mrb[56].mxu1 %v9678_v39  ;;  %v9920_v56 = vand.u32 4294901760, %v6781_v29 }
 0x118   : > { %2527 = vmatmul.mubr.f32.vlgmr.msra.gmra.mrb[0].mxu0 %v9507_v34  ;;  %8983 = vmatpush3.msra.mxu1 %v9683_v31  ;;  %v9817_v34 = vand.u32 4294901760, %v4967_v58  ;;  %v9936_v59 = vsub.f32 %v3948_v44, %v9922_v57  ;;  %v8725_v58 = vld [vmem:[%s10206_s1 + $0x40] sm:$0xff] }
 0x119   : > { %3014 = vmatpush1.msra.mxu0 %v9766_v63  ;;  %3077 = vmatprep.mubr.f32.mxu0 %v9245_v0  ;;  %v9933_v25 = vsub.f32 %v6781_v29, %v9920_v56  ;;  %v7718_v8 = vsel %vm194_vm1, %v8725_v58, 0 }
 0x11a   : > { %3094 = vmatprep.subr.mxu0 %v3093_v13  ;;  %8984 = vmatprep.mubr.msk.f32.mxu1 %vm9250_vm0, %v9245_v0 }
 0x11b   : > { %8985 = vmatmul.mubr.f32.vlgmr.msra.gmra.mrb[58].mxu1 %v9678_v39  ;;  %8987 = vmatprep.subr.mxu1 %v9245_v0  ;;  %v7327_v51 = vand.u32 4294901760, %v9933_v25 }
 0x11c   : > { %8988 = vmatpush3.msra.mxu1 %v9764_v36  ;;  %8989 = vmatprep.mubr.msk.f32.mxu1 %vm9250_vm0, %v9245_v0 }
 0x11d   : > { %8992 = vmatprep.subr.mxu1 %v9245_v0 }
 0x11f   : > { %8990 = vmatmul.mubr.f32.vlgmr.msra.gmra.mrb[60].mxu1 %v9817_v34 }
 0x120   : > { %3083 = vmatmul.mubr.f32.vlgmr.msra.gmra.mrb[0].mxu0 %v9656_v5  ;;  %8993 = vmatpush3.msra.mxu1 %v5443_v18  ;;  %v9843_v5 = vand.u32 4294901760, %v5838_v23  ;;  %v9994_v18 = vand.u32 4294901760, %v7718_v8 }
 0x121   : > { %3100 = vmatpush1.msra.mxu0 %v3099_v19  ;;  %3163 = vmatprep.mubr.f32.mxu0 %v9245_v0 }
 0x122   : > { %3173 = vmatprep.subr.mxu0 %v9751_v60  ;;  %8994 = vmatprep.mubr.msk.f32.mxu1 %vm9250_vm0, %v9245_v0  ;;  %v9853_v26 = vsub.f32 %v5838_v23, %v9843_v5  ;;  %v4035_v60 = vsub.f32 %v9906_v42, %v4034_v38  ;;  %v10004_v19 = vsub.f32 %v7718_v8, %v9994_v18 }
 0x123   : > { %8995 = vmatmul.mubr.f32.vlgmr.msra.gmra.mrb[62].mxu1 %v9759_v37  ;;  %8997 = vmatprep.subr.mxu1 %v9245_v0 }
 0x124   : > { %8998 = vmatpush3.msra.mxu1 %v9778_v4  ;;  %8999 = vmatprep.mubr.msk.f32.mxu1 %vm9250_vm0, %v9245_v0  ;;  %v6384_v30 = vand.u32 4294901760, %v9853_v26  ;;  %v10017_v20 = vand.u32 4294901760, %v10004_v19 }
 0x125   : > { %9002 = vmatprep.subr.mxu1 %v9245_v0 }
 0x126   : > { %v6385_v31 = vsub.f32 %v9853_v26, %v6384_v30 }
 0x127   : > { %9000 = vmatmul.mubr.f32.vlgmr.msra.gmra.mrb[64].mxu1 %v9773_v2 }
 0x128   : > { %3165 = vmatmul.mubr.f32.vlgmr.msra.gmra.mrb[0].mxu0 %v9600_v14  ;;  %9003 = vmatpush3.msra.mxu1 %v9764_v36  ;;  %v6386_v43 = vand.u32 4294901760, %v6385_v31 }
 0x129   : > { %3176 = vmatpush1.msra.mxu0 %v9781_v6  ;;  %3239 = vmatprep.mubr.f32.mxu0 %v9245_v0  ;;  %v7328_v6 = vsub.f32 %v9933_v25, %v7327_v51 }
 0x12a   : > { %3249 = vmatprep.subr.mxu0 %v9736_v55  ;;  %9004 = vmatprep.mubr.msk.f32.mxu1 %vm9250_vm0, %v9245_v0 }
 0x12b   : > { %9005 = vmatmul.mubr.f32.vlgmr.msra.gmra.mrb[66].mxu1 %v9794_v9  ;;  %9007 = vmatprep.subr.mxu1 %v9245_v0 }
 0x12c   : > { %9008 = vmatpush3.msra.mxu1 %v5441_v21  ;;  %9009 = vmatprep.mubr.msk.f32.mxu1 %vm9250_vm0, %v9245_v0 }
 0x12d   : > { %9012 = vmatprep.subr.mxu1 %v9245_v0 }
 0x12f   : > { %9010 = vmatmul.mubr.f32.vlgmr.msra.gmra.mrb[68].mxu1 %v9759_v37 }
 0x130   : > { %3242 = vmatmul.mubr.f32.vlgmr.msra.gmra.mrb[0].mxu0 %v9613_v16  ;;  %9013 = vmatpush3.msra.mxu1 %v9764_v36  ;;  %v9885_v16 = vand.u32 4294901760, %v5910_v7  ;;  %v4040_v36 = vand.u32 4294901760, %v9936_v59  ;;  %v4893_v7 = vsel %vm198_vm3, %v9394_v50, 0 }
 0x131   : > { %3251 = vmatpush1.msra.mxu0 %v9766_v63  ;;  %3314 = vmatprep.mubr.f32.mxu0 %v9245_v0  ;;  %v10046_v33 = vand.u32 4294901760, %v4893_v7 }
 0x132   : > { %3327 = vmatprep.subr.mxu0 %v3091_v61  ;;  %9014 = vmatprep.mubr.msk.f32.mxu1 %vm9250_vm0, %v9245_v0  ;;  %v4036_v61 = vand.u32 4294901760, %v4035_v60  ;;  %v4041_v54 = vsub.f32 %v9936_v59, %v4040_v36 }
 0x133   : > { %9015 = vmatmul.mubr.f32.vlgmr.msra.gmra.mrb[70].mxu1 %v9759_v37  ;;  %9017 = vmatprep.subr.mxu1 %v9245_v0  ;;  %v10054_v50 = vsub.f32 %v4893_v7, %v10046_v33 }
 0x134   : > { %9018 = vmatpush3.msra.mxu1 %v9843_v5  ;;  %9019 = vmatprep.mubr.msk.f32.mxu1 %vm9250_vm0, %v9245_v0  ;;  %v4042_v13 = vand.u32 4294901760, %v4041_v54 }
 0x135   : > { %9022 = vmatprep.subr.mxu1 %v9245_v0 }
 0x137   : > { %9020 = vmatmul.mubr.f32.vlgmr.msra.gmra.mrb[72].mxu1 %v9885_v16 }
 0x138   : > { %3318 = vmatmul.mubr.f32.vlgmr.msra.gmra.mrb[0].mxu0 %v9634_v15  ;;  %9023 = vmatpush3.msra.mxu1 %v6386_v43  ;;  %v9915_v15 = vand.u32 4294901760, %v6775_v53  ;;  %v4977_v43 = vand.u32 4294901760, %v10054_v50 }
 0x139   : > { %3331 = vmatpush1.msra.mxu0 %v3097_v12  ;;  %3394 = vmatprep.mubr.f32.mxu0 %v9245_v0  ;;  %v7329_v12 = vand.u32 4294901760, %v7328_v6 }
 0x13a   : > { %3403 = vmatprep.subr.mxu0 %v9736_v55  ;;  %9024 = vmatprep.mubr.msk.f32.mxu1 %vm9250_vm0, %v9245_v0  ;;  %v9928_v55 = vsub.f32 %v6775_v53, %v9915_v15  ;;  %v4978_v45 = vsub.f32 %v10054_v50, %v4977_v43 }
 0x13b   : > { %9025 = vmatmul.mubr.f32.vlgmr.msra.gmra.mrb[74].mxu1 %v9838_v62  ;;  %9027 = vmatprep.subr.mxu1 %v9245_v0 }
 0x13c   : > { %9028 = vmatpush3.msra.mxu1 %v9853_v26  ;;  %9029 = vmatprep.mubr.msk.f32.mxu1 %vm9250_vm0, %v9245_v0  ;;  %v9949_v48 = vand.u32 4294901760, %v9928_v55  ;;  %v7796_v26 = vsub.f32 %v10004_v19, %v10017_v20  ;;  %v4979_v52 = vand.u32 4294901760, %v4978_v45 }
 0x13d   : > { %9032 = vmatprep.subr.mxu1 %v9245_v0 }
 0x13e   : > { %v6853_v4 = vsub.f32 %v9928_v55, %v9949_v48 }
 0x13f   : > { %9030 = vmatmul.mubr.f32.vlgmr.msra.gmra.mrb[76].mxu1 %v9848_v24 }
 0x140   : > { %3396 = vmatmul.mubr.f32.vlgmr.msra.gmra.mrb[0].mxu0 %v9600_v14  ;;  %9033 = vmatpush3.msra.mxu1 %v9843_v5 }
 0x141   : > { %3405 = vmatpush1.msra.mxu0 %v9766_v63  ;;  %3468 = vmatprep.mubr.f32.mxu0 %v9245_v0  ;;  %v9956_v63 = vpop.permute.xlu1 %7709 }
 0x142   : > { %3955 = vmatprep.subr.mxu0 %v9894_v40  ;;  %9034 = vmatprep.mubr.msk.f32.mxu1 %vm9250_vm0, %v9245_v0 }
 0x143   : > { %9035 = vmatmul.mubr.f32.vlgmr.msra.gmra.mrb[78].mxu1 %v9863_v28  ;;  %9037 = vmatprep.subr.mxu1 %v9245_v0 }
 0x144   : > { %9038 = vmatpush3.msra.mxu1 %v6384_v30  ;;  %9039 = vmatprep.mubr.msk.f32.mxu1 %vm9250_vm0, %v9245_v0 }
 0x145   : > { %9042 = vmatprep.subr.mxu1 %v9245_v0  ;;  %v7712_v21 = vpop.permute.xlu1 %7711 }
 0x146   : > { %v7716_v17 = vsel %vm7713_vm10, %v9956_v63, %v7712_v21 }
 0x147   : > { %9040 = vmatmul.mubr.f32.vlgmr.msra.gmra.mrb[80].mxu1 %v9838_v62  ;;  %v7724_v1 = vsel %vm198_vm3, %v7716_v17, 0 }
 0x148   : > { %3470 = vmatmul.mubr.f32.vlgmr.msra.gmra.mrb[0].mxu0 %v9600_v14  ;;  %9043 = vmatpush3.msra.mxu1 %v9843_v5  ;;  %v9973_v14 = vand.u32 4294901760, %v6853_v4  ;;  %v9255_v5 = vmov 0  }
 0x149   : > { %3957 = vmatpush1.msra.mxu0 %v9922_v57  ;;  %4020 = vmatprep.mubr.f32.mxu0 %v9245_v0 }
 0x14a   : > { %4037 = vmatprep.subr.mxu0 %v4036_v61  ;;  %9044 = vmatprep.mubr.msk.f32.mxu1 %vm9250_vm0, %v9245_v0 }
 0x14b   : > { %9045 = vmatmul.mubr.f32.vlgmr.msra.gmra.mrb[82].mxu1 %v9838_v62  ;;  %9047 = vmatprep.subr.mxu1 %v9245_v0 }
 0x14c   : > { %9048 = vmatpush3.msra.mxu1 %v9920_v56  ;;  %9049 = vmatprep.mubr.msk.f32.mxu1 %vm9250_vm0, %v9245_v0 }
 0x14d   : > { %9052 = vmatprep.subr.mxu1 %v9245_v0  ;;  %9233 = vset.pattern.permute.xlu0 %v9255_v5 }
 0x14e   : > { %8643 = vperm.xlu0 %9233, %v8640_v22   ;;  %v5834_v22 = vsel %vm198_vm3, %v9439_v11, 0 }
 0x14f   : > { %9050 = vmatmul.mubr.f32.vlgmr.msra.gmra.mrb[84].mxu1 %v9973_v14 }
 0x150   : > { %4026 = vmatmul.mubr.f32.vlgmr.msra.gmra.mrb[0].mxu0 %v9727_v27  ;;  %9053 = vmatpush3.msra.mxu1 %v7329_v12  ;;  %v9999_v27 = vand.u32 4294901760, %v7724_v1 }
 0x151   : > { %4043 = vmatpush1.msra.mxu0 %v4042_v13  ;;  %4106 = vmatprep.mubr.f32.mxu0 %v9245_v0  ;;  %v5836_v13 = vsel %vm198_vm3, %v9422_v3, 0 }
 0x152   : > { %4116 = vmatprep.subr.mxu0 %v9906_v42  ;;  %9054 = vmatprep.mubr.msk.f32.mxu1 %vm9250_vm0, %v9245_v0  ;;  %v8269_v10 = vsub.f32 %v7724_v1, %v9999_v27  ;;  %v10103_v8 = vand.u32 4294901760, %v5836_v13 }
 0x153   : > { %9055 = vmatmul.mubr.f32.vlgmr.msra.gmra.mrb[86].mxu1 %v9915_v15  ;;  %9057 = vmatprep.subr.mxu1 %v9245_v0 }
 0x154   : > { %9058 = vmatpush3.msra.mxu1 %v9933_v25  ;;  %9059 = vmatprep.mubr.msk.f32.mxu1 %vm9250_vm0, %v9245_v0  ;;  %v8270_v23 = vand.u32 4294901760, %v8269_v10 }
 0x155   : > { %9062 = vmatprep.subr.mxu1 %v9245_v0 }
 0x156   : > { %v8271_v30 = vsub.f32 %v8269_v10, %v8270_v23 }
 0x157   : > { %9060 = vmatmul.mubr.f32.vlgmr.msra.gmra.mrb[88].mxu1 %v9928_v55 }
 0x158   : > { %4108 = vmatmul.mubr.f32.vlgmr.msra.gmra.mrb[0].mxu0 %v9678_v39  ;;  %9063 = vmatpush3.msra.mxu1 %v9920_v56  ;;  %v8272_v31 = vand.u32 4294901760, %v8271_v30 }
 0x159   : > { %4119 = vmatpush1.msra.mxu0 %v9936_v59  ;;  %4182 = vmatprep.mubr.f32.mxu0 %v9245_v0 }
 0x15a   : > { %4192 = vmatprep.subr.mxu0 %v9894_v40  ;;  %9064 = vmatprep.mubr.msk.f32.mxu1 %vm9250_vm0, %v9245_v0 }
 0x15b   : > { %9065 = vmatmul.mubr.f32.vlgmr.msra.gmra.mrb[90].mxu1 %v9949_v48  ;;  %9067 = vmatprep.subr.mxu1 %v9245_v0 }
 0x15c   : > { %9068 = vmatpush3.msra.mxu1 %v7327_v51  ;;  %9069 = vmatprep.mubr.msk.f32.mxu1 %vm9250_vm0, %v9245_v0 }
 0x15d   : > { %9072 = vmatprep.subr.mxu1 %v9245_v0 }
 0x15f   : > { %9070 = vmatmul.mubr.f32.vlgmr.msra.gmra.mrb[92].mxu1 %v9915_v15 }
 0x160   : > { %4185 = vmatmul.mubr.f32.vlgmr.msra.gmra.mrb[0].mxu0 %v9688_v32  ;;  %9073 = vmatpush3.msra.mxu1 %v9920_v56  ;;  %v10040_v32 = vand.u32 4294901760, %v7796_v26  ;;  %v10111_v26 = vand.u32 4294901760, %v5834_v22 }
 0x161   : > { %4194 = vmatpush1.msra.mxu0 %v9922_v57  ;;  %4257 = vmatprep.mubr.f32.mxu0 %v9245_v0 }
 0x162   : > { %4270 = vmatprep.subr.mxu0 %v4034_v38  ;;  %9074 = vmatprep.mubr.msk.f32.mxu1 %vm9250_vm0, %v9245_v0 }
 0x163   : > { %9075 = vmatmul.mubr.f32.vlgmr.msra.gmra.mrb[94].mxu1 %v9915_v15  ;;  %9077 = vmatprep.subr.mxu1 %v9245_v0 }
 0x164   : > { %9078 = vmatpush3.msra.mxu1 %v9999_v27  ;;  %9079 = vmatprep.mubr.msk.f32.mxu1 %vm9250_vm0, %v9245_v0 }
 0x165   : > { %9082 = vmatprep.subr.mxu1 %v9245_v0 }
 0x167   : > { %9080 = vmatmul.mubr.f32.vlgmr.msra.gmra.mrb[96].mxu1 %v10040_v32 }
 0x168   : > { %4261 = vmatmul.mubr.f32.vlgmr.msra.gmra.mrb[0].mxu0 %v9703_v35  ;;  %9083 = vmatpush3.msra.mxu1 %v8272_v31  ;;  %v10065_v35 = vand.u32 4294901760, %v4891_v41 }
 0x169   : > { %4274 = vmatpush1.msra.mxu0 %v4040_v36  ;;  %4337 = vmatprep.mubr.f32.mxu0 %v9245_v0 }
 0x16a   : > { %4346 = vmatprep.subr.mxu0 %v9894_v40  ;;  %9084 = vmatprep.mubr.msk.f32.mxu1 %vm9250_vm0, %v9245_v0  ;;  %v4982_v47 = vsub.f32 %v4891_v41, %v10065_v35 }
 0x16b   : > { %9085 = vmatmul.mubr.f32.vlgmr.msra.gmra.mrb[98].mxu1 %v9994_v18  ;;  %9087 = vmatprep.subr.mxu1 %v9245_v0 }
 0x16c   : > { %9088 = vmatpush3.msra.mxu1 %v8269_v10  ;;  %9089 = vmatprep.mubr.msk.f32.mxu1 %vm9250_vm0, %v9245_v0  ;;  %v4983_v40 = vand.u32 4294901760, %v4982_v47 }
 0x16d   : > { %9092 = vmatprep.subr.mxu1 %v9245_v0 }
 0x16e   : > { %v4984_v42 = vsub.f32 %v4982_v47, %v4983_v40 }
 0x16f   : > { %9090 = vmatmul.mubr.f32.vlgmr.msra.gmra.mrb[100].mxu1 %v10004_v19 }
 0x170   : > { %4339 = vmatmul.mubr.f32.vlgmr.msra.gmra.mrb[0].mxu0 %v9678_v39  ;;  %9093 = vmatpush3.msra.mxu1 %v9999_v27  ;;  %v4985_v44 = vand.u32 4294901760, %v4984_v42 }
 0x171   : > { %4348 = vmatpush1.msra.mxu0 %v9922_v57  ;;  %4411 = vmatprep.mubr.f32.mxu0 %v9245_v0 }
 0x172   : > { %4898 = vmatprep.subr.mxu0 %v10046_v33  ;;  %9094 = vmatprep.mubr.msk.f32.mxu1 %vm9250_vm0, %v9245_v0 }
 0x173   : > { %9095 = vmatmul.mubr.f32.vlgmr.msra.gmra.mrb[102].mxu1 %v10017_v20  ;;  %9097 = vmatprep.subr.mxu1 %v9245_v0 }
 0x174   : > { %9098 = vmatpush3.msra.mxu1 %v8270_v23  ;;  %9099 = vmatprep.mubr.msk.f32.mxu1 %vm9250_vm0, %v9245_v0 }
 0x175   : > { %9102 = vmatprep.subr.mxu1 %v9245_v0 }
 0x176   : > { %v742_v53 = vpop.f32.mrb[0].mxu1 }
 0x177   : > { %9100 = vmatmul.mubr.f32.vlgmr.msra.gmra.mrb[104].mxu1 %v9994_v18  ;;  %v8841_v29 = vpop.f32.mrb[1].mxu1 }
 0x178   : > { %4413 = vmatmul.mubr.f32.vlgmr.msra.gmra.mrb[0].mxu0 %v9678_v39  ;;  %9103 = vmatpush3.msra.mxu1 %v9999_v27 }
 0x179   : > { %4900 = vmatpush1.msra.mxu0 %v10065_v35  ;;  %4963 = vmatprep.mubr.f32.mxu0 %v9245_v0 }
 0x17a   : > { %4980 = vmatprep.subr.mxu0 %v4979_v52  ;;  %9104 = vmatprep.mubr.msk.f32.mxu1 %vm9250_vm0, %v9245_v0 }
 0x17b   : > { %9105 = vmatmul.mubr.f32.vlgmr.msra.gmra.mrb[106].mxu1 %v9994_v18 }
 0x17e   : > { %v818_v56 = vpop.f32.mrb[2].mxu1 }
 0x17f   : > { %v819_v57 = vadd.f32 %v818_v56, %v742_v53  ;;  %v8846_v38 = vpop.f32.mrb[3].mxu1 }
 0x180   : > { %4969 = vmatmul.mubr.f32.vlgmr.msra.gmra.mrb[0].mxu0 %v9817_v34 }
 0x181   : > { %4986 = vmatpush1.msra.mxu0 %v4985_v44  ;;  %5049 = vmatprep.mubr.f32.mxu0 %v9245_v0 }
 0x182   : > { %5059 = vmatprep.subr.mxu0 %v10054_v50  ;;  %v892_v39 = vpop.f32.mrb[4].mxu1 }
 0x183   : > { %v893_v25 = vadd.f32 %v892_v39, %v819_v57  ;;  %v8851_v59 = vpop.f32.mrb[5].mxu1 }
 0x186   : > { %v966_v60 = vpop.f32.mrb[6].mxu1 }
 0x187   : > { %v967_v51 = vadd.f32 %v966_v60, %v893_v25  ;;  %v8856_v36 = vpop.f32.mrb[7].mxu1 }
 0x188   : > { %5051 = vmatmul.mubr.f32.vlgmr.msra.gmra.mrb[0].mxu0 %v9759_v37 }
 0x189   : > { %5062 = vmatpush1.msra.mxu0 %v4982_v47  ;;  %5125 = vmatprep.mubr.f32.mxu0 %v9245_v0 }
 0x18a   : > { %5135 = vmatprep.subr.mxu0 %v10046_v33  ;;  %v1040_v61 = vpop.f32.mrb[8].mxu1 }
 0x18b   : > { %v1041_v34 = vadd.f32 %v1040_v61, %v967_v51  ;;  %v8861_v4 = vpop.f32.mrb[9].mxu1 }
 0x18e   : > { %v1112_v6 = vpop.f32.mrb[10].mxu1 }
 0x18f   : > { %v1113_v54 = vadd.f32 %v1112_v6, %v1041_v34  ;;  %v8866_v21 = vpop.f32.mrb[11].mxu1 }
 0x190   : > { %5128 = vmatmul.mubr.f32.vlgmr.msra.gmra.mrb[0].mxu0 %v9773_v2  ;;  %v5919_v2 = vsub.f32 %v5836_v13, %v10103_v8 }
 0x191   : > { %5137 = vmatpush1.msra.mxu0 %v10065_v35  ;;  %5200 = vmatprep.mubr.f32.mxu0 %v9245_v0 }
 0x192   : > { %5213 = vmatprep.subr.mxu0 %v4977_v43  ;;  %v1665_v12 = vpop.f32.mrb[12].mxu1  ;;  %v5920_v30 = vand.u32 4294901760, %v5919_v2 }
 0x193   : > { %v1666_v58 = vadd.f32 %v1665_v12, %v1113_v54  ;;  %v8871_v17 = vpop.f32.mrb[13].mxu1  ;;  %v6779_v12 = vsel %vm198_vm3, %v9532_v46, 0 }
 0x194   : > { %v5921_v11 = vsub.f32 %v5919_v2, %v5920_v30 }
 0x196   : > { %v1741_v1 = vpop.f32.mrb[14].mxu1  ;;  %v5922_v45 = vand.u32 4294901760, %v5921_v11 }
 0x197   : > { %v1742_v27 = vadd.f32 %v1741_v1, %v1666_v58  ;;  %v8876_v10 = vpop.f32.mrb[15].mxu1  ;;  %v10131_v58 = vand.u32 4294901760, %v6779_v12 }
 0x198   : > { %5204 = vmatmul.mubr.f32.vlgmr.msra.gmra.mrb[0].mxu0 %v9794_v9  ;;  %v5925_v9 = vsub.f32 %v5834_v22, %v10111_v26  ;;  %v6777_v10 = vsel %vm198_vm3, %v9535_v49, 0 }
 0x199   : > { %5217 = vmatpush1.msra.mxu0 %v4983_v40  ;;  %5280 = vmatprep.mubr.f32.mxu0 %v9245_v0 }
 0x19a   : > { %5289 = vmatprep.subr.mxu0 %v10046_v33  ;;  %v1815_v3 = vpop.f32.mrb[16].mxu1  ;;  %v5926_v47 = vand.u32 4294901760, %v5925_v9 }
 0x19b   : > { %v1816_v23 = vadd.f32 %v1815_v3, %v1742_v27  ;;  %v8881_v5 = vpop.f32.mrb[17].mxu1  ;;  %v10141_v3 = vand.u32 4294901760, %v6777_v10 }
 0x19e   : > { %v1889_v7 = vpop.f32.mrb[18].mxu1 }
 0x19f   : > { %v1890_v31 = vadd.f32 %v1889_v7, %v1816_v23  ;;  %v8886_v50 = vpop.f32.mrb[19].mxu1  ;;  %v6868_v7 = vsub.f32 %v6777_v10, %v10141_v3 }
 0x1a0   : > { %5282 = vmatmul.mubr.f32.vlgmr.msra.gmra.mrb[0].mxu0 %v9759_v37 }
 0x1a1   : > { %5291 = vmatpush1.msra.mxu0 %v10065_v35  ;;  %5354 = vmatprep.mubr.f32.mxu0 %v9245_v0  ;;  %v5927_v35 = vsub.f32 %v5925_v9, %v5926_v47 }
 0x1a2   : > { %5841 = vmatprep.subr.mxu0 %v10103_v8  ;;  %v1963_v33 = vpop.f32.mrb[20].mxu1 }
 0x1a3   : > { %v1964_v41 = vadd.f32 %v1963_v33, %v1890_v31  ;;  %v8891_v43 = vpop.f32.mrb[21].mxu1  ;;  %v5928_v44 = vand.u32 4294901760, %v5927_v35 }
 0x1a6   : > { %v2035_v40 = vpop.f32.mrb[22].mxu1 }
 0x1a7   : > { %v2036_v52 = vadd.f32 %v2035_v40, %v1964_v41  ;;  %v8896_v53 = vpop.f32.mrb[23].mxu1 }
 0x1a8   : > { %5356 = vmatmul.mubr.f32.vlgmr.msra.gmra.mrb[0].mxu0 %v9759_v37 }
 0x1a9   : > { %5843 = vmatpush1.msra.mxu0 %v10111_v26  ;;  %5906 = vmatprep.mubr.f32.mxu0 %v9245_v0 }
 0x1aa   : > { %5923 = vmatprep.subr.mxu0 %v5922_v45  ;;  %v2605_v29 = vpop.f32.mrb[24].mxu1 }
 0x1ab   : > { %v8901_v42 = vpop.f32.mrb[25].mxu1 }
 0x1ae   : > { %v2681_v56 = vpop.f32.mrb[26].mxu1 }
 0x1af   : > { %v2682_v57 = vadd.f32 %v2681_v56, %v2605_v29  ;;  %v8906_v38 = vpop.f32.mrb[27].mxu1 }
 0x1b0   : > { %5912 = vmatmul.mubr.f32.vlgmr.msra.gmra.mrb[0].mxu0 %v9885_v16 }
 0x1b1   : > { %5929 = vmatpush1.msra.mxu0 %v5928_v44  ;;  %5992 = vmatprep.mubr.f32.mxu0 %v9245_v0 }
 0x1b2   : > { %6002 = vmatprep.subr.mxu0 %v5919_v2  ;;  %v2755_v39 = vpop.f32.mrb[28].mxu1 }
 0x1b3   : > { %v2756_v37 = vadd.f32 %v2755_v39, %v2682_v57  ;;  %v8911_v25 = vpop.f32.mrb[29].mxu1 }
 0x1b4   : > { %v7708_v25 = vpop.permute.xlu0 %7707 }
 0x1b6   : > { %v2829_v59 = vpop.f32.mrb[30].mxu1 }
 0x1b7   : > { %v2830_v60 = vadd.f32 %v2829_v59, %v2756_v37  ;;  %v8916_v51 = vpop.f32.mrb[31].mxu1 }
 0x1b8   : > { %5994 = vmatmul.mubr.f32.vlgmr.msra.gmra.mrb[0].mxu0 %v9838_v62 }
 0x1b9   : > { %6005 = vmatpush1.msra.mxu0 %v5925_v9  ;;  %6068 = vmatprep.mubr.f32.mxu0 %v9245_v0  ;;  %v6869_v9 = vand.u32 4294901760, %v6868_v7 }
 0x1ba   : > { %6078 = vmatprep.subr.mxu0 %v10103_v8  ;;  %v2903_v36 = vpop.f32.mrb[32].mxu1 }
 0x1bb   : > { %v2904_v61 = vadd.f32 %v2903_v36, %v2830_v60  ;;  %v8921_v16 = vpop.f32.mrb[33].mxu1  ;;  %v7715_v36 = vsel %vm7713_vm10, %v7708_v25, %v9956_v63 }
 0x1be   : > { %v2975_v34 = vpop.f32.mrb[34].mxu1 }
 0x1bf   : > { %v2976_v4 = vadd.f32 %v2975_v34, %v2904_v61  ;;  %v8926_v6 = vpop.f32.mrb[35].mxu1  ;;  %v7722_v34 = vsel %vm198_vm3, %v7715_v36, 0 }
 0x1c0   : > { %6071 = vmatmul.mubr.f32.vlgmr.msra.gmra.mrb[0].mxu0 %v9848_v24  ;;  %v10136_v24 = vsub.f32 %v6779_v12, %v10131_v58  ;;  %v7706_v6 = vpop.permute.xlu0 %7705 }
 0x1c1   : > { %6080 = vmatpush1.msra.mxu0 %v10111_v26  ;;  %6143 = vmatprep.mubr.f32.mxu0 %v9245_v0  ;;  %v2981_v54 = vadd.f32 %v2976_v4, %v2036_v52  ;;  %v7714_v12 = vsel %vm7713_vm10, %v7706_v6, %v7708_v25 }
 0x1c2   : > { %6156 = vmatprep.subr.mxu0 %v5920_v30  ;;  %v3548_v21 = vpop.f32.mrb[36].mxu1  ;;  %v6863_v23 = vand.u32 4294901760, %v10136_v24 }
 0x1c3   : > { %v8931_v13 = vpop.f32.mrb[37].mxu1 }
 0x1c4   : > { %v6864_v49 = vsub.f32 %v10136_v24, %v6863_v23 }
 0x1c6   : > { %v3624_v17 = vpop.f32.mrb[38].mxu1  ;;  %v6865_v11 = vand.u32 4294901760, %v6864_v49 }
 0x1c7   : > { %v3625_v1 = vadd.f32 %v3624_v17, %v3548_v21  ;;  %v8936_v27 = vpop.f32.mrb[39].mxu1  ;;  %v7720_v17 = vsel %vm198_vm3, %v7714_v12, 0 }
 0x1c8   : > { %6147 = vmatmul.mubr.f32.vlgmr.msra.gmra.mrb[0].mxu0 %v9863_v28  ;;  %v10173_v10 = vand.u32 4294901760, %v7720_v17 }
 0x1c9   : > { %6160 = vmatpush1.msra.mxu0 %v5926_v47  ;;  %6223 = vmatprep.mubr.f32.mxu0 %v9245_v0 }
 0x1ca   : > { %6232 = vmatprep.subr.mxu0 %v10103_v8  ;;  %v3698_v46 = vpop.f32.mrb[40].mxu1 }
 0x1cb   : > { %v3699_v2 = vadd.f32 %v3698_v46, %v3625_v1  ;;  %v8941_v22 = vpop.f32.mrb[41].mxu1 }
 0x1ce   : > { %v3772_v5 = vpop.f32.mrb[42].mxu1 }
 0x1cf   : > { %v3773_v28 = vadd.f32 %v3772_v5, %v3699_v2  ;;  %v8946_v30 = vpop.f32.mrb[43].mxu1 }
 0x1d0   : > { %6225 = vmatmul.mubr.f32.vlgmr.msra.gmra.mrb[0].mxu0 %v9838_v62 }
 0x1d1   : > { %6234 = vmatpush1.msra.mxu0 %v10111_v26  ;;  %6297 = vmatprep.mubr.f32.mxu0 %v9245_v0  ;;  %v6870_v26 = vsub.f32 %v6868_v7, %v6869_v9 }
 0x1d2   : > { %6784 = vmatprep.subr.mxu0 %v10131_v58  ;;  %v3846_v8 = vpop.f32.mrb[44].mxu1 }
 0x1d3   : > { %v3847_v31 = vadd.f32 %v3846_v8, %v3773_v28  ;;  %v8951_v50 = vpop.f32.mrb[45].mxu1  ;;  %v6871_v52 = vand.u32 4294901760, %v6870_v26 }
 0x1d6   : > { %v3918_v33 = vpop.f32.mrb[46].mxu1 }
 0x1d7   : > { %v3919_v41 = vadd.f32 %v3918_v33, %v3847_v31  ;;  %v8956_v43 = vpop.f32.mrb[47].mxu1 }
 0x1d8   : > { %6299 = vmatmul.mubr.f32.vlgmr.msra.gmra.mrb[0].mxu0 %v9838_v62 }
 0x1d9   : > { %6786 = vmatpush1.msra.mxu0 %v10141_v3  ;;  %6849 = vmatprep.mubr.f32.mxu0 %v9245_v0  ;;  %v3924_v47 = vadd.f32 %v3919_v41, %v2981_v54  ;;  %v10165_v54 = vand.u32 4294901760, %v7722_v34 }
 0x1da   : > { %6866 = vmatprep.subr.mxu0 %v6865_v11  ;;  %v4491_v45 = vpop.f32.mrb[48].mxu1 }
 0x1db   : > { %v8961_v40 = vpop.f32.mrb[49].mxu1  ;;  %v7805_v63 = vsub.f32 %v7722_v34, %v10165_v54 }
 0x1dd   : > { %v7806_v46 = vand.u32 4294901760, %v7805_v63 }
 0x1de   : > { %v4567_v53 = vpop.f32.mrb[50].mxu1 }
 0x1df   : > { %v4568_v35 = vadd.f32 %v4567_v53, %v4491_v45  ;;  %v8966_v29 = vpop.f32.mrb[51].mxu1 }
 0x1e0   : > { %6855 = vmatmul.mubr.f32.vlgmr.msra.gmra.mrb[0].mxu0 %v9973_v14 }
 0x1e1   : > { %6872 = vmatpush1.msra.mxu0 %v6871_v52  ;;  %6935 = vmatprep.mubr.f32.mxu0 %v9245_v0 }
 0x1e2   : > { %6945 = vmatprep.subr.mxu0 %v10136_v24  ;;  %v4641_v62 = vpop.f32.mrb[52].mxu1 }
 0x1e3   : > { %v4642_v42 = vadd.f32 %v4641_v62, %v4568_v35  ;;  %v8971_v44 = vpop.f32.mrb[53].mxu1 }
 0x1e6   : > { %v4715_v56 = vpop.f32.mrb[54].mxu1 }
 0x1e7   : > { %v4716_v57 = vadd.f32 %v4715_v56, %v4642_v42  ;;  %v8976_v38 = vpop.f32.mrb[55].mxu1 }
 0x1e8   : > { %6937 = vmatmul.mubr.f32.vlgmr.msra.gmra.mrb[0].mxu0 %v9915_v15 }
 0x1e9   : > { %6948 = vmatpush1.msra.mxu0 %v6868_v7  ;;  %7011 = vmatprep.mubr.f32.mxu0 %v9245_v0 }
 0x1ea   : > { %7021 = vmatprep.subr.mxu0 %v10131_v58  ;;  %v4789_v39 = vpop.f32.mrb[56].mxu1 }
 0x1eb   : > { %v4790_v14 = vadd.f32 %v4789_v39, %v4716_v57  ;;  %v8981_v37 = vpop.f32.mrb[57].mxu1 }
 0x1ee   : > { %v4861_v59 = vpop.f32.mrb[58].mxu1 }
 0x1ef   : > { %v4862_v60 = vadd.f32 %v4861_v59, %v4790_v14  ;;  %v8986_v51 = vpop.f32.mrb[59].mxu1 }
 0x1f0   : > { %7014 = vmatmul.mubr.f32.vlgmr.msra.gmra.mrb[0].mxu0 %v9928_v55 }
 0x1f1   : > { %7023 = vmatpush1.msra.mxu0 %v10141_v3  ;;  %7086 = vmatprep.mubr.f32.mxu0 %v9245_v0  ;;  %v4867_v61 = vadd.f32 %v4862_v60, %v3924_v47 }
 0x1f2   : > { %7099 = vmatprep.subr.mxu0 %v6863_v23  ;;  %v5434_v16 = vpop.f32.mrb[60].mxu1 }
 0x1f3   : > { %v8991_v4 = vpop.f32.mrb[61].mxu1 }
 0x1f6   : > { %v5510_v21 = vpop.f32.mrb[62].mxu1 }
 0x1f7   : > { %v5511_v55 = vadd.f32 %v5510_v21, %v5434_v16  ;;  %v8996_v13 = vpop.f32.mrb[63].mxu1 }
 0x1f8   : > { %7090 = vmatmul.mubr.f32.vlgmr.msra.gmra.mrb[0].mxu0 %v9949_v48  ;;  %v7811_v48 = vsub.f32 %v7720_v17, %v10173_v10 }
 0x1f9   : > { %7103 = vmatpush1.msra.mxu0 %v6869_v9  ;;  %7166 = vmatprep.mubr.f32.mxu0 %v9245_v0 }
 0x1fa   : > { %7175 = vmatprep.subr.mxu0 %v10131_v58  ;;  %v5584_v1 = vpop.f32.mrb[64].mxu1  ;;  %v7807_v58 = vsub.f32 %v7805_v63, %v7806_v46  ;;  %v7812_v7 = vand.u32 4294901760, %v7811_v48 }
 0x1fb   : > { %v5585_v27 = vadd.f32 %v5584_v1, %v5511_v55  ;;  %v9001_v24 = vpop.f32.mrb[65].mxu1 }
 0x1fc   : > { %v7808_v49 = vand.u32 4294901760, %v7807_v58 }
 0x1fe   : > { %v5658_v2 = vpop.f32.mrb[66].mxu1 }
 0x1ff   : > { %v5659_v22 = vadd.f32 %v5658_v2, %v5585_v27  ;;  %v9006_v23 = vpop.f32.mrb[67].mxu1 }
 0x200   : > { %7168 = vmatmul.mubr.f32.vlgmr.msra.gmra.mrb[0].mxu0 %v9915_v15 }
 0x201   : > { %7177 = vmatpush1.msra.mxu0 %v10141_v3  ;;  %7240 = vmatprep.mubr.f32.mxu0 %v9245_v0  ;;  %v7813_v3 = vsub.f32 %v7811_v48, %v7812_v7 }
 0x202   : > { %7727 = vmatprep.subr.mxu0 %v10165_v54  ;;  %v5732_v5 = vpop.f32.mrb[68].mxu1 }
 0x203   : > { %v5733_v28 = vadd.f32 %v5732_v5, %v5659_v22  ;;  %v9011_v30 = vpop.f32.mrb[69].mxu1  ;;  %v7814_v41 = vand.u32 4294901760, %v7813_v3 }
 0x206   : > { %v5804_v8 = vpop.f32.mrb[70].mxu1 }
 0x207   : > { %v5805_v31 = vadd.f32 %v5804_v8, %v5733_v28  ;;  %v9016_v50 = vpop.f32.mrb[71].mxu1 }
 0x208   : > { %7242 = vmatmul.mubr.f32.vlgmr.msra.gmra.mrb[0].mxu0 %v9915_v15 }
 0x209   : > { %7729 = vmatpush1.msra.mxu0 %v10173_v10  ;;  %7792 = vmatprep.mubr.f32.mxu0 %v9245_v0  ;;  %v5810_v9 = vadd.f32 %v5805_v31, %v4867_v61 }
 0x20a   : > { %7809 = vmatprep.subr.mxu0 %v7808_v49  ;;  %v6377_v11 = vpop.f32.mrb[72].mxu1 }
 0x20b   : > { %v9021_v33 = vpop.f32.mrb[73].mxu1 }
 0x20e   : > { %v6453_v43 = vpop.f32.mrb[74].mxu1 }
 0x20f   : > { %v6454_v26 = vadd.f32 %v6453_v43, %v6377_v11  ;;  %v9026_v47 = vpop.f32.mrb[75].mxu1 }
 0x210   : > { %7798 = vmatmul.mubr.f32.vlgmr.msra.gmra.mrb[0].mxu0 %v10040_v32 }
 0x211   : > { %7815 = vmatpush1.msra.mxu0 %v7814_v41  ;;  %7878 = vmatprep.mubr.f32.mxu0 %v9245_v0 }
 0x212   : > { %7888 = vmatprep.subr.mxu0 %v7805_v63  ;;  %v6527_v15 = vpop.f32.mrb[76].mxu1 }
 0x213   : > { %v6528_v45 = vadd.f32 %v6527_v15, %v6454_v26  ;;  %v9031_v40 = vpop.f32.mrb[77].mxu1 }
 0x216   : > { %v6601_v52 = vpop.f32.mrb[78].mxu1 }
 0x217   : > { %v6602_v53 = vadd.f32 %v6601_v52, %v6528_v45  ;;  %v9036_v35 = vpop.f32.mrb[79].mxu1 }
 0x218   : > { %7880 = vmatmul.mubr.f32.vlgmr.msra.gmra.mrb[0].mxu0 %v9994_v18 }
 0x219   : > { %7891 = vmatpush1.msra.mxu0 %v7811_v48  ;;  %7954 = vmatprep.mubr.f32.mxu0 %v9245_v0 }
 0x21a   : > { %7964 = vmatprep.subr.mxu0 %v10165_v54  ;;  %v6675_v29 = vpop.f32.mrb[80].mxu1 }
 0x21b   : > { %v6676_v62 = vadd.f32 %v6675_v29, %v6602_v53  ;;  %v9041_v32 = vpop.f32.mrb[81].mxu1 }
 0x21e   : > { %v6747_v42 = vpop.f32.mrb[82].mxu1 }
 0x21f   : > { %v6748_v44 = vadd.f32 %v6747_v42, %v6676_v62  ;;  %v9046_v56 = vpop.f32.mrb[83].mxu1 }
 0x220   : > { %7957 = vmatmul.mubr.f32.vlgmr.msra.gmra.mrb[0].mxu0 %v10004_v19 }
 0x221   : > { %7966 = vmatpush1.msra.mxu0 %v10173_v10  ;;  %8029 = vmatprep.mubr.f32.mxu0 %v9245_v0  ;;  %v6753_v57 = vadd.f32 %v6748_v44, %v5810_v9 }
 0x222   : > { %8042 = vmatprep.subr.mxu0 %v7806_v46  ;;  %v7320_v38 = vpop.f32.mrb[84].mxu1 }
 0x223   : > { %v9051_v39 = vpop.f32.mrb[85].mxu1 }
 0x226   : > { %v7396_v14 = vpop.f32.mrb[86].mxu1 }
 0x227   : > { %v7397_v37 = vadd.f32 %v7396_v14, %v7320_v38  ;;  %v9056_v25 = vpop.f32.mrb[87].mxu1 }
 0x228   : > { %8033 = vmatmul.mubr.f32.vlgmr.msra.gmra.mrb[0].mxu0 %v10017_v20 }
 0x229   : > { %8046 = vmatpush1.msra.mxu0 %v7812_v7  ;;  %8109 = vmatprep.mubr.f32.mxu0 %v9245_v0 }
 0x22a   : > { %8118 = vmatprep.subr.mxu0 %v10165_v54  ;;  %v7470_v59 = vpop.f32.mrb[88].mxu1 }
 0x22b   : > { %v7471_v19 = vadd.f32 %v7470_v59, %v7397_v37  ;;  %v9061_v60 = vpop.f32.mrb[89].mxu1 }
 0x22e   : > { %v7544_v51 = vpop.f32.mrb[90].mxu1 }
 0x22f   : > { %v7545_v36 = vadd.f32 %v7544_v51, %v7471_v19  ;;  %v9066_v61 = vpop.f32.mrb[91].mxu1 }
 0x230   : > { %8111 = vmatmul.mubr.f32.vlgmr.msra.gmra.mrb[0].mxu0 %v9994_v18 }
 0x231   : > { %8120 = vmatpush1.msra.mxu0 %v10173_v10  ;;  %8183 = vmatprep.mubr.f32.mxu0 %v9245_v0 }
 0x232   : > { %v7618_v16 = vpop.f32.mrb[92].mxu1 }
 0x233   : > { %v7619_v34 = vadd.f32 %v7618_v16, %v7545_v36  ;;  %v9071_v20 = vpop.f32.mrb[93].mxu1 }
 0x236   : > { %v7690_v4 = vpop.f32.mrb[94].mxu1 }
 0x237   : > { %v7691_v6 = vadd.f32 %v7690_v4, %v7619_v34  ;;  %v9076_v21 = vpop.f32.mrb[95].mxu1 }
 0x238   : > { %8185 = vmatmul.mubr.f32.vlgmr.msra.gmra.mrb[0].mxu0 %v9994_v18  ;;  %v8644_v18 = vpop.permute.xlu0 %8643 }
 0x239   : > { %v7696_v54 = vadd.f32 %v7691_v6, %v6753_v57 }
 0x23a   : > { %v8263_v12 = vpop.f32.mrb[96].mxu1 }
 0x23b   : > { %v9081_v55 = vpop.f32.mrb[97].mxu1 }
 0x23e   : > { %v8339_v13 = vpop.f32.mrb[98].mxu1 }
 0x23f   : > { %v8340_v63 = vadd.f32 %v8339_v13, %v8263_v12  ;;  %v9086_v17 = vpop.f32.mrb[99].mxu1 }
 0x242   : > { %v8413_v1 = vpop.f32.mrb[100].mxu1 }
 0x243   : > { %v8414_v27 = vadd.f32 %v8413_v1, %v8340_v63  ;;  %v9091_v24 = vpop.f32.mrb[101].mxu1 }
 0x246   : > { %v8487_v10 = vpop.f32.mrb[102].mxu1 }
 0x247   : > { %v8488_v0 = vadd.f32 %v8487_v10, %v8414_v27  ;;  %v9096_v46 = vpop.f32.mrb[103].mxu1 }
 0x24a   : > { %v8561_v2 = vpop.f32.mrb[104].mxu1 }
 0x24b   : > { %v8562_v22 = vadd.f32 %v8561_v2, %v8488_v0  ;;  %v9101_v23 = vpop.f32.mrb[105].mxu1 }
 0x24e   : > { %v8633_v48 = vpop.f32.mrb[106].mxu1 }
 0x24f   : > { %v8634_v58 = vadd.f32 %v8633_v48, %v8562_v22  ;;  %v9106_v5 = vpop.f32.mrb[107].mxu1 }
 0x251   : > { %v8639_v28 = vadd.f32 %v8634_v58, %v7696_v54 }
 0x253   : > { %v8648_v30 = vadd.f32 %v8644_v18, %v8639_v28 }
 0x255   : > { %v8651_v7 = vmax.f32 %v8648_v30, 0.0 }
 0x257   : > { %8654 = vst [vmem:[%s170_s24 + $0x10] sm:$0xff] %v8651_v7 }
 0x30b   : > { %v8186_v49 = vpop.f32.mrb[0].mxu0 }
 0x30c   : > { %v8646_v8 = vadd.f32 %v8644_v18, %v8186_v49  ;;  %v8188_v31 = vpop.f32.mrb[1].mxu0 }
 0x30d   : > { %v8647_v50 = vadd.f32 %v8644_v18, %v8188_v31 }
 0x30e   : > { %v8649_v3 = vmax.f32 %v8646_v8, 0.0 }
 0x30f   : > { %v8650_v9 = vmax.f32 %v8647_v50, 0.0 }
 0x310   : > { %8652 = vst [vmem:[%s170_s24] sm:$0xff] %v8649_v3 }
 0x311   : > { %8653 = vst [vmem:[%s170_s24 + $0x8] sm:$0xff] %v8650_v9 }
 0x312 PF: > { %s13_s12 = sadd.s32 1, %s9243_s12  }
 0x313   : > { %p10_p4 = scmp.ge.s32.totalorder %s13_s12, 4  }
 0x315   :  { %12 = sbr.rel (!%p10_p4) target bundleno = 1 (0x1), region = 70 }

</bundles_post_ra>
